<compile_context>
chip_gen: v5e
topology: v5e:2x2
jax: 0.10.0
libtpu: 0.0.40
codegen_flags: <defaults>
</compile_context>

<pallas_src>
import functools
import math

import jax
import jax.numpy as jnp
from jax import lax
from jax.experimental import pallas as pl
from jax.experimental.pallas import tpu as pltpu

SQRT_HALF = math.sqrt(0.5)
# Finite large-negative mask value: identical softmax result to -inf for any row with
# at least one valid key (exp underflows to exactly 0), but no NaN for all-padded rows.
NEG_MASK = -1e9


# ----------------------------------------------------------------------------
# Spec helpers (mirrors the PyTorch module)
# ----------------------------------------------------------------------------
def extend_conv_spec(convolutions):
    extended = []
    for spec in convolutions:
        if len(spec) == 3:
            extended.append(spec)
        elif len(spec) == 2:
            extended.append(spec + (1,))
        else:
            raise Exception("invalid convolution spec " + str(spec))
    return tuple(extended)


# ----------------------------------------------------------------------------
# Fused encoder kernel (one batch row per grid step)
# ----------------------------------------------------------------------------
def _make_encoder_kernel(layer_cfgs, matmul_dtype=jnp.bfloat16):
    """Builds the fused per-branch kernel.

    layer_cfgs: list of dicts {"K": int, "cout": int, "has_attn": bool}
    Kernel ref order (inputs):
      x_embed(1,S,D), mask_s1(1,S,1), mask_1s(1,1,S), ln_g(1,D), ln_b(1,D),
      fc1_w(D,C0) bf16, fc1_b(1,C0),
      per layer: conv_w(Cin, K*2*Cout) bf16, conv_b(1,2*Cout)
                 [+ win(C,C) bf16, bin(1,C), wout(C,C) bf16, bout(1,C) if has_attn],
      fc2_w(Clast,D) bf16, fc2_b(1,D)
    outputs: x_out(1,S,D), y_out(1,S,D)
    """

    def kernel(*refs):
        it = iter(refs)
        x_ref = next(it)
        mask_s1_ref = next(it)
        mask_1s_ref = next(it)
        ln_g_ref = next(it)
        ln_b_ref = next(it)
        fc1_w_ref = next(it)
        fc1_b_ref = next(it)
        layer_refs = []
        for cfg in layer_cfgs:
            w_ref = next(it)
            b_ref = next(it)
            a_refs = None
            if cfg["has_attn"]:
                a_refs = (next(it), next(it), next(it), next(it))
            layer_refs.append((w_ref, b_ref, a_refs))
        fc2_w_ref = next(it)
        fc2_b_ref = next(it)
        x_out_ref = next(it)
        y_out_ref = next(it)

        S = x_ref.shape[1]

        is_pad_s1 = mask_s1_ref[0] > 0.0          # (S, 1)  True == padded position
        mask_1s = mask_1s_ref[0]                  # (1, S)  1.0 == padded key

        # ---- embed_norm (LayerNorm over D) + eval-mode dropout (identity) ----
        x = x_ref[0].astype(jnp.float32)          # (S, D)
        mu = jnp.mean(x, axis=-1, keepdims=True)
        xc = x - mu
        var = jnp.mean(xc * xc, axis=-1, keepdims=True)
        x = xc * lax.rsqrt(var + 1e-5) * ln_g_ref[...] + ln_b_ref[...]
        input_embedding = x                       # (S, D) f32

        # ---- fc1 ----
        x = (
            jnp.dot(x.astype(matmul_dtype), fc1_w_ref[...],
                    preferred_element_type=jnp.float32)
            + fc1_b_ref[...]
        )                                          # (S, C0) f32

        # row indices for zero-filling time-shifted conv windows
        t_idx = lax.broadcasted_iota(jnp.int32, (S, 1), 0)

        # ---- conv / GLU stack (attention fused into the last layer) ----
        for (w_ref, b_ref, a_refs), cfg in zip(layer_refs, layer_cfgs):
            K, cout = cfg["K"], cfg["cout"]
            cout2 = 2 * cout
            pad_l = (K - 1) // 2                   # matches odd/even torch padding

            # masked_fill(encoder_padding_mask, 0) before the conv
            x = jnp.where(is_pad_s1, 0.0, x)       # (S, Cin)
            if cfg["has_attn"]:
                target_embedding = x               # saved pre-conv (post-mask), per spec

            # ConvTBC as ONE fat matmul: Z = x @ [W_0 | ... | W_{K-1}], then shift+sum
            z = jnp.dot(x.astype(matmul_dtype), w_ref[...],
                        preferred_element_type=jnp.float32)   # (S, K*2*cout)
            acc = jnp.zeros((S, cout2), jnp.float32)
            for k in range(K):
                d = k - pad_l                      # time shift of tap k
                zk = z[:, k * cout2:(k + 1) * cout2]
                if d != 0:
                    zk = pltpu.roll(zk, shift=(-d) % S, axis=0)
                    valid = jnp.logical_and(t_idx + d >= 0, t_idx + d < S)
                    zk = jnp.where(valid, zk, 0.0)
                acc = acc + zk
            acc = acc + b_ref[...]                 # (S, 2*cout)

            # GLU over channels
            x = acc[:, :cout] * jax.nn.sigmoid(acc[:, cout:])   # (S, cout)

            if cfg["has_attn"]:
                win_ref, bin_ref, wout_ref, bout_ref = a_refs
                residual = x
                q = (
                    jnp.dot(x.astype(matmul_dtype), win_ref[...],
                            preferred_element_type=jnp.float32)
                    + bin_ref[...]
                    + target_embedding
                ) * SQRT_HALF
                # scores[t, s] = q[t] . x[s]   (keys/values are the conv output x)
                scores = lax.dot_general(
                    q.astype(matmul_dtype), x.astype(matmul_dtype),
                    (((1,), (1,)), ((), ())),
                    preferred_element_type=jnp.float32)          # (S, S)
                scores = jnp.where(mask_1s > 0.0, NEG_MASK, scores)

                # softmax: max-subtract + EUP reciprocal
                m = jnp.max(scores, axis=-1, keepdims=True)
                e = jnp.exp(scores - m)
                denom = jnp.sum(e, axis=-1, keepdims=True)
                p = e * pl.reciprocal(denom, approx=True)

                # NOTE: spec scales by the full sequence length S
                # (s = encoder_out[1].size(1)), independent of padding.
                scale = (S * math.sqrt(1.0 / S)) if S > 0 else 0.0
                attn = jnp.dot(p.astype(matmul_dtype), x.astype(matmul_dtype),
                               preferred_element_type=jnp.float32) * scale
                x_proj = (
                    jnp.dot(attn.astype(matmul_dtype), wout_ref[...],
                            preferred_element_type=jnp.float32)
                    + bout_ref[...]
                    + residual
                ) * SQRT_HALF
                # x = glu(cat([x, x_proj], dim=2), dim=2) == x * sigmoid(x_proj)
                x = residual * jax.nn.sigmoid(x_proj)

        # ---- fc2 + pad-mask fill + residual combine ----
        xo = (
            jnp.dot(x.astype(matmul_dtype), fc2_w_ref[...],
                    preferred_element_type=jnp.float32)
            + fc2_b_ref[...]
        )                                          # (S, D)
        xo = jnp.where(is_pad_s1, 0.0, xo)
        x_out_ref[0] = xo.astype(x_out_ref.dtype)
        y_out_ref[0] = ((xo + input_embedding) * SQRT_HALF).astype(y_out_ref.dtype)

    return kernel


# ----------------------------------------------------------------------------
# Parameter initialization (same shapes/stats as the PyTorch __init__)
# ----------------------------------------------------------------------------
def init_fconv_encoder_params(key, embed_dim, convolutions, dropout=0.1):
    convs_spec = extend_conv_spec(convolutions)
    in_channels = convs_spec[0][0]
    keys = iter(jax.random.split(key, 4 + 3 * len(convs_spec)))

    params = {
        "ln_g": jnp.ones((1, embed_dim), jnp.float32),
        "ln_b": jnp.zeros((1, embed_dim), jnp.float32),
    }
    std_fc1 = math.sqrt((1 - dropout) / embed_dim)
    params["fc1_w"] = std_fc1 * jax.random.normal(next(keys), (embed_dim, in_channels), jnp.float32)
    params["fc1_b"] = jnp.zeros((1, in_channels), jnp.float32)

    conv_params, attn_params = [], []
    ic = in_channels
    for i, (oc, ksz, _res) in enumerate(convs_spec):
        std_c = math.sqrt(4 * (1.0 - dropout) / (ksz * ic))
        conv_params.append({
            "w": std_c * jax.random.normal(next(keys), (ksz, ic, 2 * oc), jnp.float32),
            "b": jnp.zeros((1, 2 * oc), jnp.float32),
        })
        if i == len(convs_spec) - 1:
            std_a = math.sqrt(1.0 / oc)
            attn_params.append({
                "win": std_a * jax.random.normal(next(keys), (oc, oc), jnp.float32),
                "bin": jnp.zeros((1, oc), jnp.float32),
                "wout": std_a * jax.random.normal(next(keys), (oc, oc), jnp.float32),
                "bout": jnp.zeros((1, oc), jnp.float32),
            })
        else:
            attn_params.append(None)
        ic = oc
    params["convs"] = conv_params
    params["attns"] = attn_params

    std_fc2 = math.sqrt(1.0 / ic)
    params["fc2_w"] = std_fc2 * jax.random.normal(next(keys), (ic, embed_dim), jnp.float32)
    params["fc2_b"] = jnp.zeros((1, embed_dim), jnp.float32)
    return params


# ----------------------------------------------------------------------------
# Forward passes
# ----------------------------------------------------------------------------
def shared_embed_transformer(embed_table, tokens, attention_mask):
    # TODO(synk): share_embed_model.transformer is an external GPT (not part of this
    # module); replaced with a deterministic embedding-table lookup of matching shape.
    del attention_mask
    return embed_table[tokens]


def fconv_encoder_forward(params, tokens, x_embed, matmul_dtype=jnp.bfloat16):
    B, S, D = x_embed.shape
    convs, attns = params["convs"], params["attns"]

    # --- static per-layer config + flattened kernel weight args ---
    layer_cfgs = []
    layer_args = []
    for cp, ap in zip(convs, attns):
        K, cin, cout2 = cp["w"].shape
        cout = cout2 // 2
        layer_cfgs.append({"K": K, "cout": cout, "has_attn": ap is not None})
        # (K, Cin, 2*Cout) -> (Cin, K*2*Cout): column block k holds tap-k weights
        w_flat = jnp.transpose(cp["w"], (1, 0, 2)).reshape(cin, K * cout2)
        layer_args.append(w_flat.astype(matmul_dtype))
        layer_args.append(cp["b"])
        if ap is not None:
            layer_args += [ap["win"].astype(matmul_dtype), ap["bin"],
                           ap["wout"].astype(matmul_dtype), ap["bout"]]

    pad_mask = tokens == 0                                    # (B, S) bool
    mask_f = pad_mask.astype(jnp.float32)
    mask_s1 = mask_f[:, :, None]                              # (B, S, 1)
    mask_1s = mask_f[:, None, :]                              # (B, 1, S)

    args = [
        x_embed, mask_s1, mask_1s,
        params["ln_g"], params["ln_b"],
        params["fc1_w"].astype(matmul_dtype), params["fc1_b"],
        *layer_args,
        params["fc2_w"].astype(matmul_dtype), params["fc2_b"],
    ]

    def row_spec(shape):        # per-batch-row blocks
        nd = len(shape)
        return pl.BlockSpec((1,) + tuple(shape[1:]),
                            lambda b, _n=nd - 1: (b,) + (0,) * _n)

    def bcast_spec(shape):      # whole-array blocks (weights / biases)
        nd = len(shape)
        return pl.BlockSpec(tuple(shape), lambda b, _n=nd: (0,) * _n)

    in_specs = [row_spec(args[0].shape), row_spec(args[1].shape), row_spec(args[2].shape)]
    in_specs += [bcast_spec(a.shape) for a in args[3:]]

    out_shapes = (jax.ShapeDtypeStruct((B, S, D), jnp.float32),
                  jax.ShapeDtypeStruct((B, S, D), jnp.float32))
    out_specs = (row_spec((B, S, D)), row_spec((B, S, D)))

    kernel = _make_encoder_kernel(layer_cfgs, matmul_dtype=matmul_dtype)
    x_out, y_out = pl.pallas_call(
        kernel,
        out_shape=out_shapes,
        grid=(B,),
        in_specs=in_specs,
        out_specs=out_specs,
        compiler_params=pltpu.CompilerParams(
            dimension_semantics=("parallel",),    # batch rows on separate TCs (v7x)
        ),
    )(*args)

    return {"src_tokens": tokens, "encoder_out": (x_out, y_out),
            "encoder_padding_mask": pad_mask}


@functools.partial(jax.jit, static_argnames=("n_src",))
def gpt_conut_encoder_forward(params, src_tokens, src_tokens_with_prev_context,
                              ctx_tokens, n_src):
    embed_table = params["embed_table"]

    # --- src branch (with previous context) ---
    attention_mask = (src_tokens_with_prev_context != 0).astype(jnp.float32)
    embed = shared_embed_transformer(embed_table, src_tokens_with_prev_context, attention_mask)
    # gather positions where the indicator == 1 (exactly n_src per row -> static shape)
    order = jnp.argsort(jnp.where(src_tokens == 1, 0, 1), axis=1, stable=True)
    idx = order[:, :n_src]                                    # (B, n_src)
    x_src = jnp.take_along_axis(embed, idx[:, :, None], axis=1)
    src_tok_gathered = jnp.take_along_axis(src_tokens_with_prev_context, idx, axis=1)
    src_out = fconv_encoder_forward(params["src_encoder"], src_tok_gathered, x_src)

    # --- ctx branch ---
    ctx_attention_mask = (ctx_tokens != 0).astype(jnp.float32)
    x_ctx = shared_embed_transformer(embed_table, ctx_tokens, ctx_attention_mask)
    ctx_out = fconv_encoder_forward(params["context_encoder"], ctx_tokens, x_ctx)

    return {
        "src_tokens": jnp.concatenate([src_out["src_tokens"], ctx_out["src_tokens"]], axis=1),
        "encoder_out": (
            jnp.concatenate([src_out["encoder_out"][0], ctx_out["encoder_out"][0]], axis=1),
            jnp.concatenate([src_out["encoder_out"][1], ctx_out["encoder_out"][1]], axis=1),
        ),
        "encoder_padding_mask": jnp.concatenate(
            [src_out["encoder_padding_mask"], ctx_out["encoder_padding_mask"]], axis=1
        ),
    }


# ----------------------------------------------------------------------------
# Example run
# ----------------------------------------------------------------------------
if __name__ == "__main__":
    B, S_prev, S_src, S_ctx, D, V = 2, 16, 8, 8, 32, 50

    key = jax.random.PRNGKey(0)
    k_emb, k_src, k_ctx, k_tok1, k_tok2 = jax.random.split(key, 5)

    params = {
        "embed_table": 0.02 * jax.random.normal(k_emb, (V, D), jnp.float32),
        "src_encoder": init_fconv_encoder_params(k_src, D, ((16, 3),) * 2, dropout=0.1),
        "context_encoder": init_fconv_encoder_params(k_ctx, D, ((32, 3),) * 2, dropout=0.1),
    }

    # tokens with previous context (all nonzero so gathered src tokens are unpadded)
    src_prev = jax.random.randint(k_tok1, (B, S_prev), 2, V)
    # indicator of src positions: exactly S_src ones per row
    ind_row = jnp.zeros((S_prev,), jnp.int32).at[jnp.arange(0, S_prev, 2)].set(1)
    src_tokens = jnp.stack([ind_row, jnp.roll(ind_row, 1)], axis=0)
    # context tokens, with some padding (zeros) at the end of row 1
    ctx_tokens = jax.random.randint(k_tok2, (B, S_ctx), 2, V)
    ctx_tokens = ctx_tokens.at[1, -2:].set(0)

    out = gpt_conut_encoder_forward(params, src_tokens, src_prev, ctx_tokens, n_src=S_src)
    jax.tree_util.tree_map(jax.block_until_ready, out)

    assert out["src_tokens"].shape == (B, S_src + S_ctx)
    assert out["encoder_out"][0].shape == (B, S_src + S_ctx, D)
    assert out["encoder_out"][1].shape == (B, S_src + S_ctx, D)
    assert out["encoder_padding_mask"].shape == (B, S_src + S_ctx)
    assert bool(jnp.all(jnp.isfinite(out["encoder_out"][0])))
    assert bool(jnp.all(jnp.isfinite(out["encoder_out"][1])))
    print("KERNEL_OK")
</pallas_src>

<mosaic_0001>
module attributes {stable_mosaic.version = 11 : i64} {
  func.func @kernel(%arg0: i32, %arg1: memref<1x8x32xf32, #tpu.memory_space<vmem>>, %arg2: memref<1x8x1xf32, #tpu.memory_space<vmem>>, %arg3: memref<1x1x8xf32, #tpu.memory_space<vmem>>, %arg4: memref<1x32xf32, #tpu.memory_space<vmem>>, %arg5: memref<1x32xf32, #tpu.memory_space<vmem>>, %arg6: memref<32x16xbf16, #tpu.memory_space<vmem>>, %arg7: memref<1x16xf32, #tpu.memory_space<vmem>>, %arg8: memref<16x96xbf16, #tpu.memory_space<vmem>>, %arg9: memref<1x32xf32, #tpu.memory_space<vmem>>, %arg10: memref<16x96xbf16, #tpu.memory_space<vmem>>, %arg11: memref<1x32xf32, #tpu.memory_space<vmem>>, %arg12: memref<16x16xbf16, #tpu.memory_space<vmem>>, %arg13: memref<1x16xf32, #tpu.memory_space<vmem>>, %arg14: memref<16x16xbf16, #tpu.memory_space<vmem>>, %arg15: memref<1x16xf32, #tpu.memory_space<vmem>>, %arg16: memref<16x32xbf16, #tpu.memory_space<vmem>>, %arg17: memref<1x32xf32, #tpu.memory_space<vmem>>, %arg18: memref<1x8x32xf32, #tpu.memory_space<vmem>>, %arg19: memref<1x8x32xf32, #tpu.memory_space<vmem>>) attributes {dimension_semantics = [#tpu.dimension_semantics<parallel>], iteration_bounds = array<i64: 2>, scalar_prefetch = 0 : i64, scratch_operands = 0 : i64, tpu.core_type = #tpu.core_type<tc>, window_params = [{transform_indices = @transform_0, window_bounds = array<i64: 1, 8, 32>}, {transform_indices = @transform_1, window_bounds = array<i64: 1, 8, 1>}, {transform_indices = @transform_2, window_bounds = array<i64: 1, 1, 8>}, {pipeline_mode = #tpu.pipeline_mode<synchronous>, transform_indices = @transform_3, window_bounds = array<i64: 1, 32>}, {pipeline_mode = #tpu.pipeline_mode<synchronous>, transform_indices = @transform_4, window_bounds = array<i64: 1, 32>}, {pipeline_mode = #tpu.pipeline_mode<synchronous>, transform_indices = @transform_5, window_bounds = array<i64: 32, 16>}, {pipeline_mode = #tpu.pipeline_mode<synchronous>, transform_indices = @transform_6, window_bounds = array<i64: 1, 16>}, {pipeline_mode = #tpu.pipeline_mode<synchronous>, transform_indices = @transform_7, window_bounds = array<i64: 16, 96>}, {pipeline_mode = #tpu.pipeline_mode<synchronous>, transform_indices = @transform_8, window_bounds = array<i64: 1, 32>}, {pipeline_mode = #tpu.pipeline_mode<synchronous>, transform_indices = @transform_9, window_bounds = array<i64: 16, 96>}, {pipeline_mode = #tpu.pipeline_mode<synchronous>, transform_indices = @transform_10, window_bounds = array<i64: 1, 32>}, {pipeline_mode = #tpu.pipeline_mode<synchronous>, transform_indices = @transform_11, window_bounds = array<i64: 16, 16>}, {pipeline_mode = #tpu.pipeline_mode<synchronous>, transform_indices = @transform_12, window_bounds = array<i64: 1, 16>}, {pipeline_mode = #tpu.pipeline_mode<synchronous>, transform_indices = @transform_13, window_bounds = array<i64: 16, 16>}, {pipeline_mode = #tpu.pipeline_mode<synchronous>, transform_indices = @transform_14, window_bounds = array<i64: 1, 16>}, {pipeline_mode = #tpu.pipeline_mode<synchronous>, transform_indices = @transform_15, window_bounds = array<i64: 16, 32>}, {pipeline_mode = #tpu.pipeline_mode<synchronous>, transform_indices = @transform_16, window_bounds = array<i64: 1, 32>}, {transform_indices = @transform_17, window_bounds = array<i64: 1, 8, 32>}, {transform_indices = @transform_18, window_bounds = array<i64: 1, 8, 32>}]} {
    %c0 = arith.constant 0 : index
    %c0_0 = arith.constant 0 : index
    %c0_1 = arith.constant 0 : index
    %0 = vector.load %arg2[%c0, %c0_0, %c0_1] : memref<1x8x1xf32, #tpu.memory_space<vmem>>, vector<1x8x1xf32>
    %1 = vector.shape_cast %0 : vector<1x8x1xf32> to vector<8x1xf32>
    %cst = arith.constant 0.000000e+00 : f32
    %2 = vector.broadcast %cst : f32 to vector<8x1xf32>
    %3 = arith.cmpf ogt, %1, %2 : vector<8x1xf32>
    %c0_2 = arith.constant 0 : index
    %c0_3 = arith.constant 0 : index
    %c0_4 = arith.constant 0 : index
    %4 = vector.load %arg3[%c0_2, %c0_3, %c0_4] : memref<1x1x8xf32, #tpu.memory_space<vmem>>, vector<1x1x8xf32>
    %5 = vector.shape_cast %4 : vector<1x1x8xf32> to vector<1x8xf32>
    %c0_5 = arith.constant 0 : index
    %c0_6 = arith.constant 0 : index
    %c0_7 = arith.constant 0 : index
    %6 = vector.load %arg1[%c0_5, %c0_6, %c0_7] : memref<1x8x32xf32, #tpu.memory_space<vmem>>, vector<1x8x32xf32>
    %7 = vector.shape_cast %6 : vector<1x8x32xf32> to vector<8x32xf32>
    %cst_8 = arith.constant dense<0.000000e+00> : vector<8xf32>
    %8 = vector.multi_reduction <add>, %7, %cst_8 [1] : vector<8x32xf32> to vector<8xf32>
    %9 = vector.shape_cast %8 : vector<8xf32> to vector<8x1xf32>
    %cst_9 = arith.constant 3.200000e+01 : f32
    %10 = vector.broadcast %cst_9 : f32 to vector<8x1xf32>
    %11 = arith.divf %9, %10 : vector<8x1xf32>
    %12 = vector.broadcast %11 : vector<8x1xf32> to vector<8x32xf32>
    %13 = arith.subf %7, %12 : vector<8x32xf32>
    %14 = arith.mulf %13, %13 : vector<8x32xf32>
    %cst_10 = arith.constant dense<0.000000e+00> : vector<8xf32>
    %15 = vector.multi_reduction <add>, %14, %cst_10 [1] : vector<8x32xf32> to vector<8xf32>
    %16 = vector.shape_cast %15 : vector<8xf32> to vector<8x1xf32>
    %cst_11 = arith.constant 3.200000e+01 : f32
    %17 = vector.broadcast %cst_11 : f32 to vector<8x1xf32>
    %18 = arith.divf %16, %17 : vector<8x1xf32>
    %cst_12 = arith.constant 9.99999974E-6 : f32
    %19 = vector.broadcast %cst_12 : f32 to vector<8x1xf32>
    %20 = arith.addf %18, %19 : vector<8x1xf32>
    %21 = math.rsqrt %20 : vector<8x1xf32>
    %22 = vector.broadcast %21 : vector<8x1xf32> to vector<8x32xf32>
    %23 = arith.mulf %13, %22 : vector<8x32xf32>
    %c0_13 = arith.constant 0 : index
    %c0_14 = arith.constant 0 : index
    %24 = vector.load %arg4[%c0_13, %c0_14] : memref<1x32xf32, #tpu.memory_space<vmem>>, vector<1x32xf32>
    %25 = vector.broadcast %24 : vector<1x32xf32> to vector<8x32xf32>
    %26 = arith.mulf %23, %25 : vector<8x32xf32>
    %c0_15 = arith.constant 0 : index
    %c0_16 = arith.constant 0 : index
    %27 = vector.load %arg5[%c0_15, %c0_16] : memref<1x32xf32, #tpu.memory_space<vmem>>, vector<1x32xf32>
    %28 = vector.broadcast %27 : vector<1x32xf32> to vector<8x32xf32>
    %29 = arith.addf %26, %28 : vector<8x32xf32>
    %30 = arith.truncf %29 : vector<8x32xf32> to vector<8x32xbf16>
    %c0_17 = arith.constant 0 : index
    %c0_18 = arith.constant 0 : index
    %31 = vector.load %arg6[%c0_17, %c0_18] : memref<32x16xbf16, #tpu.memory_space<vmem>>, vector<32x16xbf16>
    %cst_19 = arith.constant dense<0.000000e+00> : vector<8x16xf32>
    %32 = tpu.matmul %30, %31, %cst_19 {dimension_numbers = #tpu.dot_dimension_numbers<[1], [0], [0], [1], [0, 0, 1, 1], [], []>} : vector<8x32xbf16>, vector<32x16xbf16>, vector<8x16xf32> -> vector<8x16xf32>
    %c0_20 = arith.constant 0 : index
    %c0_21 = arith.constant 0 : index
    %33 = vector.load %arg7[%c0_20, %c0_21] : memref<1x16xf32, #tpu.memory_space<vmem>>, vector<1x16xf32>
    %34 = vector.broadcast %33 : vector<1x16xf32> to vector<8x16xf32>
    %35 = arith.addf %32, %34 : vector<8x16xf32>
    %36 = tpu.iota {dimensions = array<i32: 0>} : vector<8x1xi32>
    %cst_22 = arith.constant 0.000000e+00 : f32
    %37 = vector.shape_cast %3 : vector<8x1xi1> to vector<8x1xi1>
    %38 = vector.broadcast %37 : vector<8x1xi1> to vector<8x16xi1>
    %39 = vector.broadcast %cst_22 : f32 to vector<8x16xf32>
    %40 = arith.select %38, %39, %35 : vector<8x16xi1>, vector<8x16xf32>
    %41 = arith.truncf %40 : vector<8x16xf32> to vector<8x16xbf16>
    %c0_23 = arith.constant 0 : index
    %c0_24 = arith.constant 0 : index
    %42 = vector.load %arg8[%c0_23, %c0_24] : memref<16x96xbf16, #tpu.memory_space<vmem>>, vector<16x96xbf16>
    %cst_25 = arith.constant dense<0.000000e+00> : vector<8x96xf32>
    %43 = tpu.matmul %41, %42, %cst_25 {dimension_numbers = #tpu.dot_dimension_numbers<[1], [0], [0], [1], [0, 0, 1, 1], [], []>} : vector<8x16xbf16>, vector<16x96xbf16>, vector<8x96xf32> -> vector<8x96xf32>
    %cst_26 = arith.constant 0.000000e+00 : f32
    %44 = vector.broadcast %cst_26 : f32 to vector<8x32xf32>
    %45 = vector.extract_strided_slice %43 {offsets = [0, 0], sizes = [8, 32], strides = [1, 1]} : vector<8x96xf32> to vector<8x32xf32>
    %c1_i32 = arith.constant 1 : i32
    %46 = tpu.dynamic_rotate %45 by %c1_i32 dim 0 : vector<8x32xf32>, i32 -> vector<8x32xf32>
    %c-1_i32 = arith.constant -1 : i32
    %47 = vector.broadcast %c-1_i32 : i32 to vector<8x1xi32>
    %48 = arith.addi %36, %47 : vector<8x1xi32>
    %c0_i32 = arith.constant 0 : i32
    %49 = vector.broadcast %c0_i32 : i32 to vector<8x1xi32>
    %50 = arith.cmpi sge, %48, %49 : vector<8x1xi32>
    %c-1_i32_27 = arith.constant -1 : i32
    %51 = vector.broadcast %c-1_i32_27 : i32 to vector<8x1xi32>
    %52 = arith.addi %36, %51 : vector<8x1xi32>
    %c8_i32 = arith.constant 8 : i32
    %53 = vector.broadcast %c8_i32 : i32 to vector<8x1xi32>
    %54 = arith.cmpi slt, %52, %53 : vector<8x1xi32>
    %55 = arith.andi %50, %54 : vector<8x1xi1>
    %cst_28 = arith.constant 0.000000e+00 : f32
    %56 = vector.shape_cast %55 : vector<8x1xi1> to vector<8x1xi1>
    %57 = vector.broadcast %56 : vector<8x1xi1> to vector<8x32xi1>
    %58 = vector.broadcast %cst_28 : f32 to vector<8x32xf32>
    %59 = arith.select %57, %46, %58 : vector<8x32xi1>, vector<8x32xf32>
    %60 = arith.addf %44, %59 : vector<8x32xf32>
    %61 = vector.extract_strided_slice %43 {offsets = [0, 32], sizes = [8, 32], strides = [1, 1]} : vector<8x96xf32> to vector<8x32xf32>
    %62 = arith.addf %60, %61 : vector<8x32xf32>
    %63 = vector.extract_strided_slice %43 {offsets = [0, 64], sizes = [8, 32], strides = [1, 1]} : vector<8x96xf32> to vector<8x32xf32>
    %c7_i32 = arith.constant 7 : i32
    %64 = tpu.dynamic_rotate %63 by %c7_i32 dim 0 : vector<8x32xf32>, i32 -> vector<8x32xf32>
    %c1_i32_29 = arith.constant 1 : i32
    %65 = vector.broadcast %c1_i32_29 : i32 to vector<8x1xi32>
    %66 = arith.addi %36, %65 : vector<8x1xi32>
    %c0_i32_30 = arith.constant 0 : i32
    %67 = vector.broadcast %c0_i32_30 : i32 to vector<8x1xi32>
    %68 = arith.cmpi sge, %66, %67 : vector<8x1xi32>
    %c1_i32_31 = arith.constant 1 : i32
    %69 = vector.broadcast %c1_i32_31 : i32 to vector<8x1xi32>
    %70 = arith.addi %36, %69 : vector<8x1xi32>
    %c8_i32_32 = arith.constant 8 : i32
    %71 = vector.broadcast %c8_i32_32 : i32 to vector<8x1xi32>
    %72 = arith.cmpi slt, %70, %71 : vector<8x1xi32>
    %73 = arith.andi %68, %72 : vector<8x1xi1>
    %cst_33 = arith.constant 0.000000e+00 : f32
    %74 = vector.shape_cast %73 : vector<8x1xi1> to vector<8x1xi1>
    %75 = vector.broadcast %74 : vector<8x1xi1> to vector<8x32xi1>
    %76 = vector.broadcast %cst_33 : f32 to vector<8x32xf32>
    %77 = arith.select %75, %64, %76 : vector<8x32xi1>, vector<8x32xf32>
    %78 = arith.addf %62, %77 : vector<8x32xf32>
    %c0_34 = arith.constant 0 : index
    %c0_35 = arith.constant 0 : index
    %79 = vector.load %arg9[%c0_34, %c0_35] : memref<1x32xf32, #tpu.memory_space<vmem>>, vector<1x32xf32>
    %80 = vector.broadcast %79 : vector<1x32xf32> to vector<8x32xf32>
    %81 = arith.addf %78, %80 : vector<8x32xf32>
    %82 = vector.extract_strided_slice %81 {offsets = [0, 0], sizes = [8, 16], strides = [1, 1]} : vector<8x32xf32> to vector<8x16xf32>
    %83 = vector.extract_strided_slice %81 {offsets = [0, 16], sizes = [8, 16], strides = [1, 1]} : vector<8x32xf32> to vector<8x16xf32>
    %84 = arith.negf %83 : vector<8x16xf32>
    %85 = math.exp %84 : vector<8x16xf32>
    %cst_36 = arith.constant 1.000000e+00 : f32
    %86 = vector.broadcast %cst_36 : f32 to vector<8x16xf32>
    %87 = arith.addf %86, %85 : vector<8x16xf32>
    %88 = arith.divf %86, %87 : vector<8x16xf32>
    %89 = arith.mulf %82, %88 : vector<8x16xf32>
    %cst_37 = arith.constant 0.000000e+00 : f32
    %90 = vector.shape_cast %3 : vector<8x1xi1> to vector<8x1xi1>
    %91 = vector.broadcast %90 : vector<8x1xi1> to vector<8x16xi1>
    %92 = vector.broadcast %cst_37 : f32 to vector<8x16xf32>
    %93 = arith.select %91, %92, %89 : vector<8x16xi1>, vector<8x16xf32>
    %94 = arith.truncf %93 : vector<8x16xf32> to vector<8x16xbf16>
    %c0_38 = arith.constant 0 : index
    %c0_39 = arith.constant 0 : index
    %95 = vector.load %arg10[%c0_38, %c0_39] : memref<16x96xbf16, #tpu.memory_space<vmem>>, vector<16x96xbf16>
    %cst_40 = arith.constant dense<0.000000e+00> : vector<8x96xf32>
    %96 = tpu.matmul %94, %95, %cst_40 {dimension_numbers = #tpu.dot_dimension_numbers<[1], [0], [0], [1], [0, 0, 1, 1], [], []>} : vector<8x16xbf16>, vector<16x96xbf16>, vector<8x96xf32> -> vector<8x96xf32>
    %cst_41 = arith.constant 0.000000e+00 : f32
    %97 = vector.broadcast %cst_41 : f32 to vector<8x32xf32>
    %98 = vector.extract_strided_slice %96 {offsets = [0, 0], sizes = [8, 32], strides = [1, 1]} : vector<8x96xf32> to vector<8x32xf32>
    %c1_i32_42 = arith.constant 1 : i32
    %99 = tpu.dynamic_rotate %98 by %c1_i32_42 dim 0 : vector<8x32xf32>, i32 -> vector<8x32xf32>
    %c-1_i32_43 = arith.constant -1 : i32
    %100 = vector.broadcast %c-1_i32_43 : i32 to vector<8x1xi32>
    %101 = arith.addi %36, %100 : vector<8x1xi32>
    %c0_i32_44 = arith.constant 0 : i32
    %102 = vector.broadcast %c0_i32_44 : i32 to vector<8x1xi32>
    %103 = arith.cmpi sge, %101, %102 : vector<8x1xi32>
    %c-1_i32_45 = arith.constant -1 : i32
    %104 = vector.broadcast %c-1_i32_45 : i32 to vector<8x1xi32>
    %105 = arith.addi %36, %104 : vector<8x1xi32>
    %c8_i32_46 = arith.constant 8 : i32
    %106 = vector.broadcast %c8_i32_46 : i32 to vector<8x1xi32>
    %107 = arith.cmpi slt, %105, %106 : vector<8x1xi32>
    %108 = arith.andi %103, %107 : vector<8x1xi1>
    %cst_47 = arith.constant 0.000000e+00 : f32
    %109 = vector.shape_cast %108 : vector<8x1xi1> to vector<8x1xi1>
    %110 = vector.broadcast %109 : vector<8x1xi1> to vector<8x32xi1>
    %111 = vector.broadcast %cst_47 : f32 to vector<8x32xf32>
    %112 = arith.select %110, %99, %111 : vector<8x32xi1>, vector<8x32xf32>
    %113 = arith.addf %97, %112 : vector<8x32xf32>
    %114 = vector.extract_strided_slice %96 {offsets = [0, 32], sizes = [8, 32], strides = [1, 1]} : vector<8x96xf32> to vector<8x32xf32>
    %115 = arith.addf %113, %114 : vector<8x32xf32>
    %116 = vector.extract_strided_slice %96 {offsets = [0, 64], sizes = [8, 32], strides = [1, 1]} : vector<8x96xf32> to vector<8x32xf32>
    %c7_i32_48 = arith.constant 7 : i32
    %117 = tpu.dynamic_rotate %116 by %c7_i32_48 dim 0 : vector<8x32xf32>, i32 -> vector<8x32xf32>
    %c1_i32_49 = arith.constant 1 : i32
    %118 = vector.broadcast %c1_i32_49 : i32 to vector<8x1xi32>
    %119 = arith.addi %36, %118 : vector<8x1xi32>
    %c0_i32_50 = arith.constant 0 : i32
    %120 = vector.broadcast %c0_i32_50 : i32 to vector<8x1xi32>
    %121 = arith.cmpi sge, %119, %120 : vector<8x1xi32>
    %c1_i32_51 = arith.constant 1 : i32
    %122 = vector.broadcast %c1_i32_51 : i32 to vector<8x1xi32>
    %123 = arith.addi %36, %122 : vector<8x1xi32>
    %c8_i32_52 = arith.constant 8 : i32
    %124 = vector.broadcast %c8_i32_52 : i32 to vector<8x1xi32>
    %125 = arith.cmpi slt, %123, %124 : vector<8x1xi32>
    %126 = arith.andi %121, %125 : vector<8x1xi1>
    %cst_53 = arith.constant 0.000000e+00 : f32
    %127 = vector.shape_cast %126 : vector<8x1xi1> to vector<8x1xi1>
    %128 = vector.broadcast %127 : vector<8x1xi1> to vector<8x32xi1>
    %129 = vector.broadcast %cst_53 : f32 to vector<8x32xf32>
    %130 = arith.select %128, %117, %129 : vector<8x32xi1>, vector<8x32xf32>
    %131 = arith.addf %115, %130 : vector<8x32xf32>
    %c0_54 = arith.constant 0 : index
    %c0_55 = arith.constant 0 : index
    %132 = vector.load %arg11[%c0_54, %c0_55] : memref<1x32xf32, #tpu.memory_space<vmem>>, vector<1x32xf32>
    %133 = vector.broadcast %132 : vector<1x32xf32> to vector<8x32xf32>
    %134 = arith.addf %131, %133 : vector<8x32xf32>
    %135 = vector.extract_strided_slice %134 {offsets = [0, 0], sizes = [8, 16], strides = [1, 1]} : vector<8x32xf32> to vector<8x16xf32>
    %136 = vector.extract_strided_slice %134 {offsets = [0, 16], sizes = [8, 16], strides = [1, 1]} : vector<8x32xf32> to vector<8x16xf32>
    %137 = arith.negf %136 : vector<8x16xf32>
    %138 = math.exp %137 : vector<8x16xf32>
    %cst_56 = arith.constant 1.000000e+00 : f32
    %139 = vector.broadcast %cst_56 : f32 to vector<8x16xf32>
    %140 = arith.addf %139, %138 : vector<8x16xf32>
    %141 = arith.divf %139, %140 : vector<8x16xf32>
    %142 = arith.mulf %135, %141 : vector<8x16xf32>
    %143 = arith.truncf %142 : vector<8x16xf32> to vector<8x16xbf16>
    %c0_57 = arith.constant 0 : index
    %c0_58 = arith.constant 0 : index
    %144 = vector.load %arg12[%c0_57, %c0_58] : memref<16x16xbf16, #tpu.memory_space<vmem>>, vector<16x16xbf16>
    %cst_59 = arith.constant dense<0.000000e+00> : vector<8x16xf32>
    %145 = tpu.matmul %143, %144, %cst_59 {dimension_numbers = #tpu.dot_dimension_numbers<[1], [0], [0], [1], [0, 0, 1, 1], [], []>} : vector<8x16xbf16>, vector<16x16xbf16>, vector<8x16xf32> -> vector<8x16xf32>
    %c0_60 = arith.constant 0 : index
    %c0_61 = arith.constant 0 : index
    %146 = vector.load %arg13[%c0_60, %c0_61] : memref<1x16xf32, #tpu.memory_space<vmem>>, vector<1x16xf32>
    %147 = vector.broadcast %146 : vector<1x16xf32> to vector<8x16xf32>
    %148 = arith.addf %145, %147 : vector<8x16xf32>
    %149 = arith.addf %148, %93 : vector<8x16xf32>
    %cst_62 = arith.constant 0.707106769 : f32
    %150 = vector.broadcast %cst_62 : f32 to vector<8x16xf32>
    %151 = arith.mulf %149, %150 : vector<8x16xf32>
    %152 = arith.truncf %151 : vector<8x16xf32> to vector<8x16xbf16>
    %153 = arith.truncf %142 : vector<8x16xf32> to vector<8x16xbf16>
    %cst_63 = arith.constant dense<0.000000e+00> : vector<8x8xf32>
    %154 = tpu.matmul %152, %153, %cst_63 {dimension_numbers = #tpu.dot_dimension_numbers<[1], [1], [0], [0], [0, 0, 1, 0], [], []>} : vector<8x16xbf16>, vector<8x16xbf16>, vector<8x8xf32> -> vector<8x8xf32>
    %cst_64 = arith.constant 0.000000e+00 : f32
    %155 = vector.broadcast %cst_64 : f32 to vector<1x8xf32>
    %156 = arith.cmpf ogt, %5, %155 : vector<1x8xf32>
    %cst_65 = arith.constant -1.000000e+09 : f32
    %157 = vector.shape_cast %156 : vector<1x8xi1> to vector<1x8xi1>
    %158 = vector.broadcast %157 : vector<1x8xi1> to vector<8x8xi1>
    %159 = vector.broadcast %cst_65 : f32 to vector<8x8xf32>
    %160 = arith.select %158, %159, %154 : vector<8x8xi1>, vector<8x8xf32>
    %cst_66 = arith.constant dense<0xFF800000> : vector<8xf32>
    %161 = vector.multi_reduction <maximumf>, %160, %cst_66 [1] : vector<8x8xf32> to vector<8xf32>
    %162 = vector.shape_cast %161 : vector<8xf32> to vector<8x1xf32>
    %163 = vector.broadcast %162 : vector<8x1xf32> to vector<8x8xf32>
    %164 = arith.subf %160, %163 : vector<8x8xf32>
    %165 = math.exp %164 : vector<8x8xf32>
    %cst_67 = arith.constant dense<0.000000e+00> : vector<8xf32>
    %166 = vector.multi_reduction <add>, %165, %cst_67 [1] : vector<8x8xf32> to vector<8xf32>
    %167 = vector.shape_cast %166 : vector<8xf32> to vector<8x1xf32>
    %168 = tpu.reciprocal %167 {approx = true} : vector<8x1xf32> -> vector<8x1xf32>
    %169 = vector.broadcast %168 : vector<8x1xf32> to vector<8x8xf32>
    %170 = arith.mulf %165, %169 : vector<8x8xf32>
    %171 = arith.truncf %170 : vector<8x8xf32> to vector<8x8xbf16>
    %172 = arith.truncf %142 : vector<8x16xf32> to vector<8x16xbf16>
    %cst_68 = arith.constant dense<0.000000e+00> : vector<8x16xf32>
    %173 = tpu.matmul %171, %172, %cst_68 {dimension_numbers = #tpu.dot_dimension_numbers<[1], [0], [0], [1], [0, 0, 1, 1], [], []>} : vector<8x8xbf16>, vector<8x16xbf16>, vector<8x16xf32> -> vector<8x16xf32>
    %cst_69 = arith.constant 2.82842708 : f32
    %174 = vector.broadcast %cst_69 : f32 to vector<8x16xf32>
    %175 = arith.mulf %173, %174 : vector<8x16xf32>
    %176 = arith.truncf %175 : vector<8x16xf32> to vector<8x16xbf16>
    %c0_70 = arith.constant 0 : index
    %c0_71 = arith.constant 0 : index
    %177 = vector.load %arg14[%c0_70, %c0_71] : memref<16x16xbf16, #tpu.memory_space<vmem>>, vector<16x16xbf16>
    %cst_72 = arith.constant dense<0.000000e+00> : vector<8x16xf32>
    %178 = tpu.matmul %176, %177, %cst_72 {dimension_numbers = #tpu.dot_dimension_numbers<[1], [0], [0], [1], [0, 0, 1, 1], [], []>} : vector<8x16xbf16>, vector<16x16xbf16>, vector<8x16xf32> -> vector<8x16xf32>
    %c0_73 = arith.constant 0 : index
    %c0_74 = arith.constant 0 : index
    %179 = vector.load %arg15[%c0_73, %c0_74] : memref<1x16xf32, #tpu.memory_space<vmem>>, vector<1x16xf32>
    %180 = vector.broadcast %179 : vector<1x16xf32> to vector<8x16xf32>
    %181 = arith.addf %178, %180 : vector<8x16xf32>
    %182 = arith.addf %181, %142 : vector<8x16xf32>
    %cst_75 = arith.constant 0.707106769 : f32
    %183 = vector.broadcast %cst_75 : f32 to vector<8x16xf32>
    %184 = arith.mulf %182, %183 : vector<8x16xf32>
    %185 = arith.negf %184 : vector<8x16xf32>
    %186 = math.exp %185 : vector<8x16xf32>
    %cst_76 = arith.constant 1.000000e+00 : f32
    %187 = vector.broadcast %cst_76 : f32 to vector<8x16xf32>
    %188 = arith.addf %187, %186 : vector<8x16xf32>
    %189 = arith.divf %187, %188 : vector<8x16xf32>
    %190 = arith.mulf %142, %189 : vector<8x16xf32>
    %191 = arith.truncf %190 : vector<8x16xf32> to vector<8x16xbf16>
    %c0_77 = arith.constant 0 : index
    %c0_78 = arith.constant 0 : index
    %192 = vector.load %arg16[%c0_77, %c0_78] : memref<16x32xbf16, #tpu.memory_space<vmem>>, vector<16x32xbf16>
    %cst_79 = arith.constant dense<0.000000e+00> : vector<8x32xf32>
    %193 = tpu.matmul %191, %192, %cst_79 {dimension_numbers = #tpu.dot_dimension_numbers<[1], [0], [0], [1], [0, 0, 1, 1], [], []>} : vector<8x16xbf16>, vector<16x32xbf16>, vector<8x32xf32> -> vector<8x32xf32>
    %c0_80 = arith.constant 0 : index
    %c0_81 = arith.constant 0 : index
    %194 = vector.load %arg17[%c0_80, %c0_81] : memref<1x32xf32, #tpu.memory_space<vmem>>, vector<1x32xf32>
    %195 = vector.broadcast %194 : vector<1x32xf32> to vector<8x32xf32>
    %196 = arith.addf %193, %195 : vector<8x32xf32>
    %cst_82 = arith.constant 0.000000e+00 : f32
    %197 = vector.shape_cast %3 : vector<8x1xi1> to vector<8x1xi1>
    %198 = vector.broadcast %197 : vector<8x1xi1> to vector<8x32xi1>
    %199 = vector.broadcast %cst_82 : f32 to vector<8x32xf32>
    %200 = arith.select %198, %199, %196 : vector<8x32xi1>, vector<8x32xf32>
    %c0_83 = arith.constant 0 : index
    %c0_84 = arith.constant 0 : index
    %c0_85 = arith.constant 0 : index
    %201 = vector.load %arg18[%c0_83, %c0_84, %c0_85] : memref<1x8x32xf32, #tpu.memory_space<vmem>>, vector<1x8x32xf32>
    %202 = vector.shape_cast %201 : vector<1x8x32xf32> to vector<8x32xf32>
    %203 = vector.shape_cast %200 : vector<8x32xf32> to vector<1x8x32xf32>
    tpu.vector_store %arg18[%c0_83, %c0_84, %c0_85], %203 {strides = array<i32>} : memref<1x8x32xf32, #tpu.memory_space<vmem>>, vector<1x8x32xf32>,
    %204 = arith.addf %200, %29 : vector<8x32xf32>
    %cst_86 = arith.constant 0.707106769 : f32
    %205 = vector.broadcast %cst_86 : f32 to vector<8x32xf32>
    %206 = arith.mulf %204, %205 : vector<8x32xf32>
    %c0_87 = arith.constant 0 : index
    %c0_88 = arith.constant 0 : index
    %c0_89 = arith.constant 0 : index
    %207 = vector.load %arg19[%c0_87, %c0_88, %c0_89] : memref<1x8x32xf32, #tpu.memory_space<vmem>>, vector<1x8x32xf32>
    %208 = vector.shape_cast %207 : vector<1x8x32xf32> to vector<8x32xf32>
    %209 = vector.shape_cast %206 : vector<8x32xf32> to vector<1x8x32xf32>
    tpu.vector_store %arg19[%c0_87, %c0_88, %c0_89], %209 {strides = array<i32>} : memref<1x8x32xf32, #tpu.memory_space<vmem>>, vector<1x8x32xf32>,
    return
  }
  func.func @transform_0(%arg0: i32) -> (i32, i32, i32) {
    %c0_i32 = arith.constant 0 : i32
    %c0_i32_0 = arith.constant 0 : i32
    %c0_i32_1 = arith.constant 0 : i32
    return %arg0, %c0_i32, %c0_i32_0 : i32, i32, i32
  }
  func.func @transform_1(%arg0: i32) -> (i32, i32, i32) {
    %c0_i32 = arith.constant 0 : i32
    %c0_i32_0 = arith.constant 0 : i32
    %c0_i32_1 = arith.constant 0 : i32
    return %arg0, %c0_i32, %c0_i32_0 : i32, i32, i32
  }
  func.func @transform_2(%arg0: i32) -> (i32, i32, i32) {
    %c0_i32 = arith.constant 0 : i32
    %c0_i32_0 = arith.constant 0 : i32
    %c0_i32_1 = arith.constant 0 : i32
    return %arg0, %c0_i32, %c0_i32_0 : i32, i32, i32
  }
  func.func @transform_3(%arg0: i32) -> (i32, i32) {
    %c0_i32 = arith.constant 0 : i32
    %c0_i32_0 = arith.constant 0 : i32
    %c0_i32_1 = arith.constant 0 : i32
    return %c0_i32, %c0_i32_0 : i32, i32
  }
  func.func @transform_4(%arg0: i32) -> (i32, i32) {
    %c0_i32 = arith.constant 0 : i32
    %c0_i32_0 = arith.constant 0 : i32
    %c0_i32_1 = arith.constant 0 : i32
    return %c0_i32, %c0_i32_0 : i32, i32
  }
  func.func @transform_5(%arg0: i32) -> (i32, i32) {
    %c0_i32 = arith.constant 0 : i32
    %c0_i32_0 = arith.constant 0 : i32
    %c0_i32_1 = arith.constant 0 : i32
    return %c0_i32, %c0_i32_0 : i32, i32
  }
  func.func @transform_6(%arg0: i32) -> (i32, i32) {
    %c0_i32 = arith.constant 0 : i32
    %c0_i32_0 = arith.constant 0 : i32
    %c0_i32_1 = arith.constant 0 : i32
    return %c0_i32, %c0_i32_0 : i32, i32
  }
  func.func @transform_7(%arg0: i32) -> (i32, i32) {
    %c0_i32 = arith.constant 0 : i32
    %c0_i32_0 = arith.constant 0 : i32
    %c0_i32_1 = arith.constant 0 : i32
    return %c0_i32, %c0_i32_0 : i32, i32
  }
  func.func @transform_8(%arg0: i32) -> (i32, i32) {
    %c0_i32 = arith.constant 0 : i32
    %c0_i32_0 = arith.constant 0 : i32
    %c0_i32_1 = arith.constant 0 : i32
    return %c0_i32, %c0_i32_0 : i32, i32
  }
  func.func @transform_9(%arg0: i32) -> (i32, i32) {
    %c0_i32 = arith.constant 0 : i32
    %c0_i32_0 = arith.constant 0 : i32
    %c0_i32_1 = arith.constant 0 : i32
    return %c0_i32, %c0_i32_0 : i32, i32
  }
  func.func @transform_10(%arg0: i32) -> (i32, i32) {
    %c0_i32 = arith.constant 0 : i32
    %c0_i32_0 = arith.constant 0 : i32
    %c0_i32_1 = arith.constant 0 : i32
    return %c0_i32, %c0_i32_0 : i32, i32
  }
  func.func @transform_11(%arg0: i32) -> (i32, i32) {
    %c0_i32 = arith.constant 0 : i32
    %c0_i32_0 = arith.constant 0 : i32
    %c0_i32_1 = arith.constant 0 : i32
    return %c0_i32, %c0_i32_0 : i32, i32
  }
  func.func @transform_12(%arg0: i32) -> (i32, i32) {
    %c0_i32 = arith.constant 0 : i32
    %c0_i32_0 = arith.constant 0 : i32
    %c0_i32_1 = arith.constant 0 : i32
    return %c0_i32, %c0_i32_0 : i32, i32
  }
  func.func @transform_13(%arg0: i32) -> (i32, i32) {
    %c0_i32 = arith.constant 0 : i32
    %c0_i32_0 = arith.constant 0 : i32
    %c0_i32_1 = arith.constant 0 : i32
    return %c0_i32, %c0_i32_0 : i32, i32
  }
  func.func @transform_14(%arg0: i32) -> (i32, i32) {
    %c0_i32 = arith.constant 0 : i32
    %c0_i32_0 = arith.constant 0 : i32
    %c0_i32_1 = arith.constant 0 : i32
    return %c0_i32, %c0_i32_0 : i32, i32
  }
  func.func @transform_15(%arg0: i32) -> (i32, i32) {
    %c0_i32 = arith.constant 0 : i32
    %c0_i32_0 = arith.constant 0 : i32
    %c0_i32_1 = arith.constant 0 : i32
    return %c0_i32, %c0_i32_0 : i32, i32
  }
  func.func @transform_16(%arg0: i32) -> (i32, i32) {
    %c0_i32 = arith.constant 0 : i32
    %c0_i32_0 = arith.constant 0 : i32
    %c0_i32_1 = arith.constant 0 : i32
    return %c0_i32, %c0_i32_0 : i32, i32
  }
  func.func @transform_17(%arg0: i32) -> (i32, i32, i32) {
    %c0_i32 = arith.constant 0 : i32
    %c0_i32_0 = arith.constant 0 : i32
    %c0_i32_1 = arith.constant 0 : i32
    return %arg0, %c0_i32, %c0_i32_0 : i32, i32, i32
  }
  func.func @transform_18(%arg0: i32) -> (i32, i32, i32) {
    %c0_i32 = arith.constant 0 : i32
    %c0_i32_0 = arith.constant 0 : i32
    %c0_i32_1 = arith.constant 0 : i32
    return %arg0, %c0_i32, %c0_i32_0 : i32, i32, i32
  }
}

module attributes {stable_mosaic.version = 11 : i64} {
  func.func @kernel(%arg0: i32, %arg1: memref<1x8x32xf32, #tpu.memory_space<vmem>>, %arg2: memref<1x8x1xf32, #tpu.memory_space<vmem>>, %arg3: memref<1x1x8xf32, #tpu.memory_space<vmem>>, %arg4: memref<1x32xf32, #tpu.memory_space<vmem>>, %arg5: memref<1x32xf32, #tpu.memory_space<vmem>>, %arg6: memref<32x32xbf16, #tpu.memory_space<vmem>>, %arg7: memref<1x32xf32, #tpu.memory_space<vmem>>, %arg8: memref<32x192xbf16, #tpu.memory_space<vmem>>, %arg9: memref<1x64xf32, #tpu.memory_space<vmem>>, %arg10: memref<32x192xbf16, #tpu.memory_space<vmem>>, %arg11: memref<1x64xf32, #tpu.memory_space<vmem>>, %arg12: memref<32x32xbf16, #tpu.memory_space<vmem>>, %arg13: memref<1x32xf32, #tpu.memory_space<vmem>>, %arg14: memref<32x32xbf16, #tpu.memory_space<vmem>>, %arg15: memref<1x32xf32, #tpu.memory_space<vmem>>, %arg16: memref<32x32xbf16, #tpu.memory_space<vmem>>, %arg17: memref<1x32xf32, #tpu.memory_space<vmem>>, %arg18: memref<1x8x32xf32, #tpu.memory_space<vmem>>, %arg19: memref<1x8x32xf32, #tpu.memory_space<vmem>>) attributes {dimension_semantics = [#tpu.dimension_semantics<parallel>], iteration_bounds = array<i64: 2>, scalar_prefetch = 0 : i64, scratch_operands = 0 : i64, tpu.core_type = #tpu.core_type<tc>, window_params = [{transform_indices = @transform_0, window_bounds = array<i64: 1, 8, 32>}, {transform_indices = @transform_1, window_bounds = array<i64: 1, 8, 1>}, {transform_indices = @transform_2, window_bounds = array<i64: 1, 1, 8>}, {pipeline_mode = #tpu.pipeline_mode<synchronous>, transform_indices = @transform_3, window_bounds = array<i64: 1, 32>}, {pipeline_mode = #tpu.pipeline_mode<synchronous>, transform_indices = @transform_4, window_bounds = array<i64: 1, 32>}, {pipeline_mode = #tpu.pipeline_mode<synchronous>, transform_indices = @transform_5, window_bounds = array<i64: 32, 32>}, {pipeline_mode = #tpu.pipeline_mode<synchronous>, transform_indices = @transform_6, window_bounds = array<i64: 1, 32>}, {pipeline_mode = #tpu.pipeline_mode<synchronous>, transform_indices = @transform_7, window_bounds = array<i64: 32, 192>}, {pipeline_mode = #tpu.pipeline_mode<synchronous>, transform_indices = @transform_8, window_bounds = array<i64: 1, 64>}, {pipeline_mode = #tpu.pipeline_mode<synchronous>, transform_indices = @transform_9, window_bounds = array<i64: 32, 192>}, {pipeline_mode = #tpu.pipeline_mode<synchronous>, transform_indices = @transform_10, window_bounds = array<i64: 1, 64>}, {pipeline_mode = #tpu.pipeline_mode<synchronous>, transform_indices = @transform_11, window_bounds = array<i64: 32, 32>}, {pipeline_mode = #tpu.pipeline_mode<synchronous>, transform_indices = @transform_12, window_bounds = array<i64: 1, 32>}, {pipeline_mode = #tpu.pipeline_mode<synchronous>, transform_indices = @transform_13, window_bounds = array<i64: 32, 32>}, {pipeline_mode = #tpu.pipeline_mode<synchronous>, transform_indices = @transform_14, window_bounds = array<i64: 1, 32>}, {pipeline_mode = #tpu.pipeline_mode<synchronous>, transform_indices = @transform_15, window_bounds = array<i64: 32, 32>}, {pipeline_mode = #tpu.pipeline_mode<synchronous>, transform_indices = @transform_16, window_bounds = array<i64: 1, 32>}, {transform_indices = @transform_17, window_bounds = array<i64: 1, 8, 32>}, {transform_indices = @transform_18, window_bounds = array<i64: 1, 8, 32>}]} {
    %c0 = arith.constant 0 : index
    %c0_0 = arith.constant 0 : index
    %c0_1 = arith.constant 0 : index
    %0 = vector.load %arg2[%c0, %c0_0, %c0_1] : memref<1x8x1xf32, #tpu.memory_space<vmem>>, vector<1x8x1xf32>
    %1 = vector.shape_cast %0 : vector<1x8x1xf32> to vector<8x1xf32>
    %cst = arith.constant 0.000000e+00 : f32
    %2 = vector.broadcast %cst : f32 to vector<8x1xf32>
    %3 = arith.cmpf ogt, %1, %2 : vector<8x1xf32>
    %c0_2 = arith.constant 0 : index
    %c0_3 = arith.constant 0 : index
    %c0_4 = arith.constant 0 : index
    %4 = vector.load %arg3[%c0_2, %c0_3, %c0_4] : memref<1x1x8xf32, #tpu.memory_space<vmem>>, vector<1x1x8xf32>
    %5 = vector.shape_cast %4 : vector<1x1x8xf32> to vector<1x8xf32>
    %c0_5 = arith.constant 0 : index
    %c0_6 = arith.constant 0 : index
    %c0_7 = arith.constant 0 : index
    %6 = vector.load %arg1[%c0_5, %c0_6, %c0_7] : memref<1x8x32xf32, #tpu.memory_space<vmem>>, vector<1x8x32xf32>
    %7 = vector.shape_cast %6 : vector<1x8x32xf32> to vector<8x32xf32>
    %cst_8 = arith.constant dense<0.000000e+00> : vector<8xf32>
    %8 = vector.multi_reduction <add>, %7, %cst_8 [1] : vector<8x32xf32> to vector<8xf32>
    %9 = vector.shape_cast %8 : vector<8xf32> to vector<8x1xf32>
    %cst_9 = arith.constant 3.200000e+01 : f32
    %10 = vector.broadcast %cst_9 : f32 to vector<8x1xf32>
    %11 = arith.divf %9, %10 : vector<8x1xf32>
    %12 = vector.broadcast %11 : vector<8x1xf32> to vector<8x32xf32>
    %13 = arith.subf %7, %12 : vector<8x32xf32>
    %14 = arith.mulf %13, %13 : vector<8x32xf32>
    %cst_10 = arith.constant dense<0.000000e+00> : vector<8xf32>
    %15 = vector.multi_reduction <add>, %14, %cst_10 [1] : vector<8x32xf32> to vector<8xf32>
    %16 = vector.shape_cast %15 : vector<8xf32> to vector<8x1xf32>
    %cst_11 = arith.constant 3.200000e+01 : f32
    %17 = vector.broadcast %cst_11 : f32 to vector<8x1xf32>
    %18 = arith.divf %16, %17 : vector<8x1xf32>
    %cst_12 = arith.constant 9.99999974E-6 : f32
    %19 = vector.broadcast %cst_12 : f32 to vector<8x1xf32>
    %20 = arith.addf %18, %19 : vector<8x1xf32>
    %21 = math.rsqrt %20 : vector<8x1xf32>
    %22 = vector.broadcast %21 : vector<8x1xf32> to vector<8x32xf32>
    %23 = arith.mulf %13, %22 : vector<8x32xf32>
    %c0_13 = arith.constant 0 : index
    %c0_14 = arith.constant 0 : index
    %24 = vector.load %arg4[%c0_13, %c0_14] : memref<1x32xf32, #tpu.memory_space<vmem>>, vector<1x32xf32>
    %25 = vector.broadcast %24 : vector<1x32xf32> to vector<8x32xf32>
    %26 = arith.mulf %23, %25 : vector<8x32xf32>
    %c0_15 = arith.constant 0 : index
    %c0_16 = arith.constant 0 : index
    %27 = vector.load %arg5[%c0_15, %c0_16] : memref<1x32xf32, #tpu.memory_space<vmem>>, vector<1x32xf32>
    %28 = vector.broadcast %27 : vector<1x32xf32> to vector<8x32xf32>
    %29 = arith.addf %26, %28 : vector<8x32xf32>
    %30 = arith.truncf %29 : vector<8x32xf32> to vector<8x32xbf16>
    %c0_17 = arith.constant 0 : index
    %c0_18 = arith.constant 0 : index
    %31 = vector.load %arg6[%c0_17, %c0_18] : memref<32x32xbf16, #tpu.memory_space<vmem>>, vector<32x32xbf16>
    %cst_19 = arith.constant dense<0.000000e+00> : vector<8x32xf32>
    %32 = tpu.matmul %30, %31, %cst_19 {dimension_numbers = #tpu.dot_dimension_numbers<[1], [0], [0], [1], [0, 0, 1, 1], [], []>} : vector<8x32xbf16>, vector<32x32xbf16>, vector<8x32xf32> -> vector<8x32xf32>
    %c0_20 = arith.constant 0 : index
    %c0_21 = arith.constant 0 : index
    %33 = vector.load %arg7[%c0_20, %c0_21] : memref<1x32xf32, #tpu.memory_space<vmem>>, vector<1x32xf32>
    %34 = vector.broadcast %33 : vector<1x32xf32> to vector<8x32xf32>
    %35 = arith.addf %32, %34 : vector<8x32xf32>
    %36 = tpu.iota {dimensions = array<i32: 0>} : vector<8x1xi32>
    %cst_22 = arith.constant 0.000000e+00 : f32
    %37 = vector.shape_cast %3 : vector<8x1xi1> to vector<8x1xi1>
    %38 = vector.broadcast %37 : vector<8x1xi1> to vector<8x32xi1>
    %39 = vector.broadcast %cst_22 : f32 to vector<8x32xf32>
    %40 = arith.select %38, %39, %35 : vector<8x32xi1>, vector<8x32xf32>
    %41 = arith.truncf %40 : vector<8x32xf32> to vector<8x32xbf16>
    %c0_23 = arith.constant 0 : index
    %c0_24 = arith.constant 0 : index
    %42 = vector.load %arg8[%c0_23, %c0_24] : memref<32x192xbf16, #tpu.memory_space<vmem>>, vector<32x192xbf16>
    %cst_25 = arith.constant dense<0.000000e+00> : vector<8x192xf32>
    %43 = tpu.matmul %41, %42, %cst_25 {dimension_numbers = #tpu.dot_dimension_numbers<[1], [0], [0], [1], [0, 0, 1, 1], [], []>} : vector<8x32xbf16>, vector<32x192xbf16>, vector<8x192xf32> -> vector<8x192xf32>
    %cst_26 = arith.constant 0.000000e+00 : f32
    %44 = vector.broadcast %cst_26 : f32 to vector<8x64xf32>
    %45 = vector.extract_strided_slice %43 {offsets = [0, 0], sizes = [8, 64], strides = [1, 1]} : vector<8x192xf32> to vector<8x64xf32>
    %c1_i32 = arith.constant 1 : i32
    %46 = tpu.dynamic_rotate %45 by %c1_i32 dim 0 : vector<8x64xf32>, i32 -> vector<8x64xf32>
    %c-1_i32 = arith.constant -1 : i32
    %47 = vector.broadcast %c-1_i32 : i32 to vector<8x1xi32>
    %48 = arith.addi %36, %47 : vector<8x1xi32>
    %c0_i32 = arith.constant 0 : i32
    %49 = vector.broadcast %c0_i32 : i32 to vector<8x1xi32>
    %50 = arith.cmpi sge, %48, %49 : vector<8x1xi32>
    %c-1_i32_27 = arith.constant -1 : i32
    %51 = vector.broadcast %c-1_i32_27 : i32 to vector<8x1xi32>
    %52 = arith.addi %36, %51 : vector<8x1xi32>
    %c8_i32 = arith.constant 8 : i32
    %53 = vector.broadcast %c8_i32 : i32 to vector<8x1xi32>
    %54 = arith.cmpi slt, %52, %53 : vector<8x1xi32>
    %55 = arith.andi %50, %54 : vector<8x1xi1>
    %cst_28 = arith.constant 0.000000e+00 : f32
    %56 = vector.shape_cast %55 : vector<8x1xi1> to vector<8x1xi1>
    %57 = vector.broadcast %56 : vector<8x1xi1> to vector<8x64xi1>
    %58 = vector.broadcast %cst_28 : f32 to vector<8x64xf32>
    %59 = arith.select %57, %46, %58 : vector<8x64xi1>, vector<8x64xf32>
    %60 = arith.addf %44, %59 : vector<8x64xf32>
    %61 = vector.extract_strided_slice %43 {offsets = [0, 64], sizes = [8, 64], strides = [1, 1]} : vector<8x192xf32> to vector<8x64xf32>
    %62 = arith.addf %60, %61 : vector<8x64xf32>
    %63 = vector.extract_strided_slice %43 {offsets = [0, 128], sizes = [8, 64], strides = [1, 1]} : vector<8x192xf32> to vector<8x64xf32>
    %c7_i32 = arith.constant 7 : i32
    %64 = tpu.dynamic_rotate %63 by %c7_i32 dim 0 : vector<8x64xf32>, i32 -> vector<8x64xf32>
    %c1_i32_29 = arith.constant 1 : i32
    %65 = vector.broadcast %c1_i32_29 : i32 to vector<8x1xi32>
    %66 = arith.addi %36, %65 : vector<8x1xi32>
    %c0_i32_30 = arith.constant 0 : i32
    %67 = vector.broadcast %c0_i32_30 : i32 to vector<8x1xi32>
    %68 = arith.cmpi sge, %66, %67 : vector<8x1xi32>
    %c1_i32_31 = arith.constant 1 : i32
    %69 = vector.broadcast %c1_i32_31 : i32 to vector<8x1xi32>
    %70 = arith.addi %36, %69 : vector<8x1xi32>
    %c8_i32_32 = arith.constant 8 : i32
    %71 = vector.broadcast %c8_i32_32 : i32 to vector<8x1xi32>
    %72 = arith.cmpi slt, %70, %71 : vector<8x1xi32>
    %73 = arith.andi %68, %72 : vector<8x1xi1>
    %cst_33 = arith.constant 0.000000e+00 : f32
    %74 = vector.shape_cast %73 : vector<8x1xi1> to vector<8x1xi1>
    %75 = vector.broadcast %74 : vector<8x1xi1> to vector<8x64xi1>
    %76 = vector.broadcast %cst_33 : f32 to vector<8x64xf32>
    %77 = arith.select %75, %64, %76 : vector<8x64xi1>, vector<8x64xf32>
    %78 = arith.addf %62, %77 : vector<8x64xf32>
    %c0_34 = arith.constant 0 : index
    %c0_35 = arith.constant 0 : index
    %79 = vector.load %arg9[%c0_34, %c0_35] : memref<1x64xf32, #tpu.memory_space<vmem>>, vector<1x64xf32>
    %80 = vector.broadcast %79 : vector<1x64xf32> to vector<8x64xf32>
    %81 = arith.addf %78, %80 : vector<8x64xf32>
    %82 = vector.extract_strided_slice %81 {offsets = [0, 0], sizes = [8, 32], strides = [1, 1]} : vector<8x64xf32> to vector<8x32xf32>
    %83 = vector.extract_strided_slice %81 {offsets = [0, 32], sizes = [8, 32], strides = [1, 1]} : vector<8x64xf32> to vector<8x32xf32>
    %84 = arith.negf %83 : vector<8x32xf32>
    %85 = math.exp %84 : vector<8x32xf32>
    %cst_36 = arith.constant 1.000000e+00 : f32
    %86 = vector.broadcast %cst_36 : f32 to vector<8x32xf32>
    %87 = arith.addf %86, %85 : vector<8x32xf32>
    %88 = arith.divf %86, %87 : vector<8x32xf32>
    %89 = arith.mulf %82, %88 : vector<8x32xf32>
    %cst_37 = arith.constant 0.000000e+00 : f32
    %90 = vector.shape_cast %3 : vector<8x1xi1> to vector<8x1xi1>
    %91 = vector.broadcast %90 : vector<8x1xi1> to vector<8x32xi1>
    %92 = vector.broadcast %cst_37 : f32 to vector<8x32xf32>
    %93 = arith.select %91, %92, %89 : vector<8x32xi1>, vector<8x32xf32>
    %94 = arith.truncf %93 : vector<8x32xf32> to vector<8x32xbf16>
    %c0_38 = arith.constant 0 : index
    %c0_39 = arith.constant 0 : index
    %95 = vector.load %arg10[%c0_38, %c0_39] : memref<32x192xbf16, #tpu.memory_space<vmem>>, vector<32x192xbf16>
    %cst_40 = arith.constant dense<0.000000e+00> : vector<8x192xf32>
    %96 = tpu.matmul %94, %95, %cst_40 {dimension_numbers = #tpu.dot_dimension_numbers<[1], [0], [0], [1], [0, 0, 1, 1], [], []>} : vector<8x32xbf16>, vector<32x192xbf16>, vector<8x192xf32> -> vector<8x192xf32>
    %cst_41 = arith.constant 0.000000e+00 : f32
    %97 = vector.broadcast %cst_41 : f32 to vector<8x64xf32>
    %98 = vector.extract_strided_slice %96 {offsets = [0, 0], sizes = [8, 64], strides = [1, 1]} : vector<8x192xf32> to vector<8x64xf32>
    %c1_i32_42 = arith.constant 1 : i32
    %99 = tpu.dynamic_rotate %98 by %c1_i32_42 dim 0 : vector<8x64xf32>, i32 -> vector<8x64xf32>
    %c-1_i32_43 = arith.constant -1 : i32
    %100 = vector.broadcast %c-1_i32_43 : i32 to vector<8x1xi32>
    %101 = arith.addi %36, %100 : vector<8x1xi32>
    %c0_i32_44 = arith.constant 0 : i32
    %102 = vector.broadcast %c0_i32_44 : i32 to vector<8x1xi32>
    %103 = arith.cmpi sge, %101, %102 : vector<8x1xi32>
    %c-1_i32_45 = arith.constant -1 : i32
    %104 = vector.broadcast %c-1_i32_45 : i32 to vector<8x1xi32>
    %105 = arith.addi %36, %104 : vector<8x1xi32>
    %c8_i32_46 = arith.constant 8 : i32
    %106 = vector.broadcast %c8_i32_46 : i32 to vector<8x1xi32>
    %107 = arith.cmpi slt, %105, %106 : vector<8x1xi32>
    %108 = arith.andi %103, %107 : vector<8x1xi1>
    %cst_47 = arith.constant 0.000000e+00 : f32
    %109 = vector.shape_cast %108 : vector<8x1xi1> to vector<8x1xi1>
    %110 = vector.broadcast %109 : vector<8x1xi1> to vector<8x64xi1>
    %111 = vector.broadcast %cst_47 : f32 to vector<8x64xf32>
    %112 = arith.select %110, %99, %111 : vector<8x64xi1>, vector<8x64xf32>
    %113 = arith.addf %97, %112 : vector<8x64xf32>
    %114 = vector.extract_strided_slice %96 {offsets = [0, 64], sizes = [8, 64], strides = [1, 1]} : vector<8x192xf32> to vector<8x64xf32>
    %115 = arith.addf %113, %114 : vector<8x64xf32>
    %116 = vector.extract_strided_slice %96 {offsets = [0, 128], sizes = [8, 64], strides = [1, 1]} : vector<8x192xf32> to vector<8x64xf32>
    %c7_i32_48 = arith.constant 7 : i32
    %117 = tpu.dynamic_rotate %116 by %c7_i32_48 dim 0 : vector<8x64xf32>, i32 -> vector<8x64xf32>
    %c1_i32_49 = arith.constant 1 : i32
    %118 = vector.broadcast %c1_i32_49 : i32 to vector<8x1xi32>
    %119 = arith.addi %36, %118 : vector<8x1xi32>
    %c0_i32_50 = arith.constant 0 : i32
    %120 = vector.broadcast %c0_i32_50 : i32 to vector<8x1xi32>
    %121 = arith.cmpi sge, %119, %120 : vector<8x1xi32>
    %c1_i32_51 = arith.constant 1 : i32
    %122 = vector.broadcast %c1_i32_51 : i32 to vector<8x1xi32>
    %123 = arith.addi %36, %122 : vector<8x1xi32>
    %c8_i32_52 = arith.constant 8 : i32
    %124 = vector.broadcast %c8_i32_52 : i32 to vector<8x1xi32>
    %125 = arith.cmpi slt, %123, %124 : vector<8x1xi32>
    %126 = arith.andi %121, %125 : vector<8x1xi1>
    %cst_53 = arith.constant 0.000000e+00 : f32
    %127 = vector.shape_cast %126 : vector<8x1xi1> to vector<8x1xi1>
    %128 = vector.broadcast %127 : vector<8x1xi1> to vector<8x64xi1>
    %129 = vector.broadcast %cst_53 : f32 to vector<8x64xf32>
    %130 = arith.select %128, %117, %129 : vector<8x64xi1>, vector<8x64xf32>
    %131 = arith.addf %115, %130 : vector<8x64xf32>
    %c0_54 = arith.constant 0 : index
    %c0_55 = arith.constant 0 : index
    %132 = vector.load %arg11[%c0_54, %c0_55] : memref<1x64xf32, #tpu.memory_space<vmem>>, vector<1x64xf32>
    %133 = vector.broadcast %132 : vector<1x64xf32> to vector<8x64xf32>
    %134 = arith.addf %131, %133 : vector<8x64xf32>
    %135 = vector.extract_strided_slice %134 {offsets = [0, 0], sizes = [8, 32], strides = [1, 1]} : vector<8x64xf32> to vector<8x32xf32>
    %136 = vector.extract_strided_slice %134 {offsets = [0, 32], sizes = [8, 32], strides = [1, 1]} : vector<8x64xf32> to vector<8x32xf32>
    %137 = arith.negf %136 : vector<8x32xf32>
    %138 = math.exp %137 : vector<8x32xf32>
    %cst_56 = arith.constant 1.000000e+00 : f32
    %139 = vector.broadcast %cst_56 : f32 to vector<8x32xf32>
    %140 = arith.addf %139, %138 : vector<8x32xf32>
    %141 = arith.divf %139, %140 : vector<8x32xf32>
    %142 = arith.mulf %135, %141 : vector<8x32xf32>
    %143 = arith.truncf %142 : vector<8x32xf32> to vector<8x32xbf16>
    %c0_57 = arith.constant 0 : index
    %c0_58 = arith.constant 0 : index
    %144 = vector.load %arg12[%c0_57, %c0_58] : memref<32x32xbf16, #tpu.memory_space<vmem>>, vector<32x32xbf16>
    %cst_59 = arith.constant dense<0.000000e+00> : vector<8x32xf32>
    %145 = tpu.matmul %143, %144, %cst_59 {dimension_numbers = #tpu.dot_dimension_numbers<[1], [0], [0], [1], [0, 0, 1, 1], [], []>} : vector<8x32xbf16>, vector<32x32xbf16>, vector<8x32xf32> -> vector<8x32xf32>
    %c0_60 = arith.constant 0 : index
    %c0_61 = arith.constant 0 : index
    %146 = vector.load %arg13[%c0_60, %c0_61] : memref<1x32xf32, #tpu.memory_space<vmem>>, vector<1x32xf32>
    %147 = vector.broadcast %146 : vector<1x32xf32> to vector<8x32xf32>
    %148 = arith.addf %145, %147 : vector<8x32xf32>
    %149 = arith.addf %148, %93 : vector<8x32xf32>
    %cst_62 = arith.constant 0.707106769 : f32
    %150 = vector.broadcast %cst_62 : f32 to vector<8x32xf32>
    %151 = arith.mulf %149, %150 : vector<8x32xf32>
    %152 = arith.truncf %151 : vector<8x32xf32> to vector<8x32xbf16>
    %153 = arith.truncf %142 : vector<8x32xf32> to vector<8x32xbf16>
    %cst_63 = arith.constant dense<0.000000e+00> : vector<8x8xf32>
    %154 = tpu.matmul %152, %153, %cst_63 {dimension_numbers = #tpu.dot_dimension_numbers<[1], [1], [0], [0], [0, 0, 1, 0], [], []>} : vector<8x32xbf16>, vector<8x32xbf16>, vector<8x8xf32> -> vector<8x8xf32>
    %cst_64 = arith.constant 0.000000e+00 : f32
    %155 = vector.broadcast %cst_64 : f32 to vector<1x8xf32>
    %156 = arith.cmpf ogt, %5, %155 : vector<1x8xf32>
    %cst_65 = arith.constant -1.000000e+09 : f32
    %157 = vector.shape_cast %156 : vector<1x8xi1> to vector<1x8xi1>
    %158 = vector.broadcast %157 : vector<1x8xi1> to vector<8x8xi1>
    %159 = vector.broadcast %cst_65 : f32 to vector<8x8xf32>
    %160 = arith.select %158, %159, %154 : vector<8x8xi1>, vector<8x8xf32>
    %cst_66 = arith.constant dense<0xFF800000> : vector<8xf32>
    %161 = vector.multi_reduction <maximumf>, %160, %cst_66 [1] : vector<8x8xf32> to vector<8xf32>
    %162 = vector.shape_cast %161 : vector<8xf32> to vector<8x1xf32>
    %163 = vector.broadcast %162 : vector<8x1xf32> to vector<8x8xf32>
    %164 = arith.subf %160, %163 : vector<8x8xf32>
    %165 = math.exp %164 : vector<8x8xf32>
    %cst_67 = arith.constant dense<0.000000e+00> : vector<8xf32>
    %166 = vector.multi_reduction <add>, %165, %cst_67 [1] : vector<8x8xf32> to vector<8xf32>
    %167 = vector.shape_cast %166 : vector<8xf32> to vector<8x1xf32>
    %168 = tpu.reciprocal %167 {approx = true} : vector<8x1xf32> -> vector<8x1xf32>
    %169 = vector.broadcast %168 : vector<8x1xf32> to vector<8x8xf32>
    %170 = arith.mulf %165, %169 : vector<8x8xf32>
    %171 = arith.truncf %170 : vector<8x8xf32> to vector<8x8xbf16>
    %172 = arith.truncf %142 : vector<8x32xf32> to vector<8x32xbf16>
    %cst_68 = arith.constant dense<0.000000e+00> : vector<8x32xf32>
    %173 = tpu.matmul %171, %172, %cst_68 {dimension_numbers = #tpu.dot_dimension_numbers<[1], [0], [0], [1], [0, 0, 1, 1], [], []>} : vector<8x8xbf16>, vector<8x32xbf16>, vector<8x32xf32> -> vector<8x32xf32>
    %cst_69 = arith.constant 2.82842708 : f32
    %174 = vector.broadcast %cst_69 : f32 to vector<8x32xf32>
    %175 = arith.mulf %173, %174 : vector<8x32xf32>
    %176 = arith.truncf %175 : vector<8x32xf32> to vector<8x32xbf16>
    %c0_70 = arith.constant 0 : index
    %c0_71 = arith.constant 0 : index
    %177 = vector.load %arg14[%c0_70, %c0_71] : memref<32x32xbf16, #tpu.memory_space<vmem>>, vector<32x32xbf16>
    %cst_72 = arith.constant dense<0.000000e+00> : vector<8x32xf32>
    %178 = tpu.matmul %176, %177, %cst_72 {dimension_numbers = #tpu.dot_dimension_numbers<[1], [0], [0], [1], [0, 0, 1, 1], [], []>} : vector<8x32xbf16>, vector<32x32xbf16>, vector<8x32xf32> -> vector<8x32xf32>
    %c0_73 = arith.constant 0 : index
    %c0_74 = arith.constant 0 : index
    %179 = vector.load %arg15[%c0_73, %c0_74] : memref<1x32xf32, #tpu.memory_space<vmem>>, vector<1x32xf32>
    %180 = vector.broadcast %179 : vector<1x32xf32> to vector<8x32xf32>
    %181 = arith.addf %178, %180 : vector<8x32xf32>
    %182 = arith.addf %181, %142 : vector<8x32xf32>
    %cst_75 = arith.constant 0.707106769 : f32
    %183 = vector.broadcast %cst_75 : f32 to vector<8x32xf32>
    %184 = arith.mulf %182, %183 : vector<8x32xf32>
    %185 = arith.negf %184 : vector<8x32xf32>
    %186 = math.exp %185 : vector<8x32xf32>
    %cst_76 = arith.constant 1.000000e+00 : f32
    %187 = vector.broadcast %cst_76 : f32 to vector<8x32xf32>
    %188 = arith.addf %187, %186 : vector<8x32xf32>
    %189 = arith.divf %187, %188 : vector<8x32xf32>
    %190 = arith.mulf %142, %189 : vector<8x32xf32>
    %191 = arith.truncf %190 : vector<8x32xf32> to vector<8x32xbf16>
    %c0_77 = arith.constant 0 : index
    %c0_78 = arith.constant 0 : index
    %192 = vector.load %arg16[%c0_77, %c0_78] : memref<32x32xbf16, #tpu.memory_space<vmem>>, vector<32x32xbf16>
    %cst_79 = arith.constant dense<0.000000e+00> : vector<8x32xf32>
    %193 = tpu.matmul %191, %192, %cst_79 {dimension_numbers = #tpu.dot_dimension_numbers<[1], [0], [0], [1], [0, 0, 1, 1], [], []>} : vector<8x32xbf16>, vector<32x32xbf16>, vector<8x32xf32> -> vector<8x32xf32>
    %c0_80 = arith.constant 0 : index
    %c0_81 = arith.constant 0 : index
    %194 = vector.load %arg17[%c0_80, %c0_81] : memref<1x32xf32, #tpu.memory_space<vmem>>, vector<1x32xf32>
    %195 = vector.broadcast %194 : vector<1x32xf32> to vector<8x32xf32>
    %196 = arith.addf %193, %195 : vector<8x32xf32>
    %cst_82 = arith.constant 0.000000e+00 : f32
    %197 = vector.shape_cast %3 : vector<8x1xi1> to vector<8x1xi1>
    %198 = vector.broadcast %197 : vector<8x1xi1> to vector<8x32xi1>
    %199 = vector.broadcast %cst_82 : f32 to vector<8x32xf32>
    %200 = arith.select %198, %199, %196 : vector<8x32xi1>, vector<8x32xf32>
    %c0_83 = arith.constant 0 : index
    %c0_84 = arith.constant 0 : index
    %c0_85 = arith.constant 0 : index
    %201 = vector.load %arg18[%c0_83, %c0_84, %c0_85] : memref<1x8x32xf32, #tpu.memory_space<vmem>>, vector<1x8x32xf32>
    %202 = vector.shape_cast %201 : vector<1x8x32xf32> to vector<8x32xf32>
    %203 = vector.shape_cast %200 : vector<8x32xf32> to vector<1x8x32xf32>
    tpu.vector_store %arg18[%c0_83, %c0_84, %c0_85], %203 {strides = array<i32>} : memref<1x8x32xf32, #tpu.memory_space<vmem>>, vector<1x8x32xf32>,
    %204 = arith.addf %200, %29 : vector<8x32xf32>
    %cst_86 = arith.constant 0.707106769 : f32
    %205 = vector.broadcast %cst_86 : f32 to vector<8x32xf32>
    %206 = arith.mulf %204, %205 : vector<8x32xf32>
    %c0_87 = arith.constant 0 : index
    %c0_88 = arith.constant 0 : index
    %c0_89 = arith.constant 0 : index
    %207 = vector.load %arg19[%c0_87, %c0_88, %c0_89] : memref<1x8x32xf32, #tpu.memory_space<vmem>>, vector<1x8x32xf32>
    %208 = vector.shape_cast %207 : vector<1x8x32xf32> to vector<8x32xf32>
    %209 = vector.shape_cast %206 : vector<8x32xf32> to vector<1x8x32xf32>
    tpu.vector_store %arg19[%c0_87, %c0_88, %c0_89], %209 {strides = array<i32>} : memref<1x8x32xf32, #tpu.memory_space<vmem>>, vector<1x8x32xf32>,
    return
  }
  func.func @transform_0(%arg0: i32) -> (i32, i32, i32) {
    %c0_i32 = arith.constant 0 : i32
    %c0_i32_0 = arith.constant 0 : i32
    %c0_i32_1 = arith.constant 0 : i32
    return %arg0, %c0_i32, %c0_i32_0 : i32, i32, i32
  }
  func.func @transform_1(%arg0: i32) -> (i32, i32, i32) {
    %c0_i32 = arith.constant 0 : i32
    %c0_i32_0 = arith.constant 0 : i32
    %c0_i32_1 = arith.constant 0 : i32
    return %arg0, %c0_i32, %c0_i32_0 : i32, i32, i32
  }
  func.func @transform_2(%arg0: i32) -> (i32, i32, i32) {
    %c0_i32 = arith.constant 0 : i32
    %c0_i32_0 = arith.constant 0 : i32
    %c0_i32_1 = arith.constant 0 : i32
    return %arg0, %c0_i32, %c0_i32_0 : i32, i32, i32
  }
  func.func @transform_3(%arg0: i32) -> (i32, i32) {
    %c0_i32 = arith.constant 0 : i32
    %c0_i32_0 = arith.constant 0 : i32
    %c0_i32_1 = arith.constant 0 : i32
    return %c0_i32, %c0_i32_0 : i32, i32
  }
  func.func @transform_4(%arg0: i32) -> (i32, i32) {
    %c0_i32 = arith.constant 0 : i32
    %c0_i32_0 = arith.constant 0 : i32
    %c0_i32_1 = arith.constant 0 : i32
    return %c0_i32, %c0_i32_0 : i32, i32
  }
  func.func @transform_5(%arg0: i32) -> (i32, i32) {
    %c0_i32 = arith.constant 0 : i32
    %c0_i32_0 = arith.constant 0 : i32
    %c0_i32_1 = arith.constant 0 : i32
    return %c0_i32, %c0_i32_0 : i32, i32
  }
  func.func @transform_6(%arg0: i32) -> (i32, i32) {
    %c0_i32 = arith.constant 0 : i32
    %c0_i32_0 = arith.constant 0 : i32
    %c0_i32_1 = arith.constant 0 : i32
    return %c0_i32, %c0_i32_0 : i32, i32
  }
  func.func @transform_7(%arg0: i32) -> (i32, i32) {
    %c0_i32 = arith.constant 0 : i32
    %c0_i32_0 = arith.constant 0 : i32
    %c0_i32_1 = arith.constant 0 : i32
    return %c0_i32, %c0_i32_0 : i32, i32
  }
  func.func @transform_8(%arg0: i32) -> (i32, i32) {
    %c0_i32 = arith.constant 0 : i32
    %c0_i32_0 = arith.constant 0 : i32
    %c0_i32_1 = arith.constant 0 : i32
    return %c0_i32, %c0_i32_0 : i32, i32
  }
  func.func @transform_9(%arg0: i32) -> (i32, i32) {
    %c0_i32 = arith.constant 0 : i32
    %c0_i32_0 = arith.constant 0 : i32
    %c0_i32_1 = arith.constant 0 : i32
    return %c0_i32, %c0_i32_0 : i32, i32
  }
  func.func @transform_10(%arg0: i32) -> (i32, i32) {
    %c0_i32 = arith.constant 0 : i32
    %c0_i32_0 = arith.constant 0 : i32
    %c0_i32_1 = arith.constant 0 : i32
    return %c0_i32, %c0_i32_0 : i32, i32
  }
  func.func @transform_11(%arg0: i32) -> (i32, i32) {
    %c0_i32 = arith.constant 0 : i32
    %c0_i32_0 = arith.constant 0 : i32
    %c0_i32_1 = arith.constant 0 : i32
    return %c0_i32, %c0_i32_0 : i32, i32
  }
  func.func @transform_12(%arg0: i32) -> (i32, i32) {
    %c0_i32 = arith.constant 0 : i32
    %c0_i32_0 = arith.constant 0 : i32
    %c0_i32_1 = arith.constant 0 : i32
    return %c0_i32, %c0_i32_0 : i32, i32
  }
  func.func @transform_13(%arg0: i32) -> (i32, i32) {
    %c0_i32 = arith.constant 0 : i32
    %c0_i32_0 = arith.constant 0 : i32
    %c0_i32_1 = arith.constant 0 : i32
    return %c0_i32, %c0_i32_0 : i32, i32
  }
  func.func @transform_14(%arg0: i32) -> (i32, i32) {
    %c0_i32 = arith.constant 0 : i32
    %c0_i32_0 = arith.constant 0 : i32
    %c0_i32_1 = arith.constant 0 : i32
    return %c0_i32, %c0_i32_0 : i32, i32
  }
  func.func @transform_15(%arg0: i32) -> (i32, i32) {
    %c0_i32 = arith.constant 0 : i32
    %c0_i32_0 = arith.constant 0 : i32
    %c0_i32_1 = arith.constant 0 : i32
    return %c0_i32, %c0_i32_0 : i32, i32
  }
  func.func @transform_16(%arg0: i32) -> (i32, i32) {
    %c0_i32 = arith.constant 0 : i32
    %c0_i32_0 = arith.constant 0 : i32
    %c0_i32_1 = arith.constant 0 : i32
    return %c0_i32, %c0_i32_0 : i32, i32
  }
  func.func @transform_17(%arg0: i32) -> (i32, i32, i32) {
    %c0_i32 = arith.constant 0 : i32
    %c0_i32_0 = arith.constant 0 : i32
    %c0_i32_1 = arith.constant 0 : i32
    return %arg0, %c0_i32, %c0_i32_0 : i32, i32, i32
  }
  func.func @transform_18(%arg0: i32) -> (i32, i32, i32) {
    %c0_i32 = arith.constant 0 : i32
    %c0_i32_0 = arith.constant 0 : i32
    %c0_i32_1 = arith.constant 0 : i32
    return %arg0, %c0_i32, %c0_i32_0 : i32, i32, i32
  }
}

</mosaic_0001>

<bundles_post_ra>
// kernel: gpt_conut_encoder_forward.2
= control target key start
LH: loop header
LB: loop body
LE: loop exit
PB: predicated region body
PF: predicated region fallthrough
CT: control target
= control target key end

     0   :  { %s1337_s27 = smov 0   ;;  %s1467_s0 = inlined_call_operand.vmem [shape: f32[2,8,32], index: 0, kind: input, shape index: {}]   ;;  %s1468_s1 = inlined_call_operand.vmem [shape: f32[2,8,1], index: 1, kind: input, shape index: {}]   ;;  %s1469_s2 = inlined_call_operand.vmem [shape: f32[2,1,8], index: 2, kind: input, shape index: {}]   ;;  %s1470_s3 = inlined_call_operand.vmem [shape: f32[1,32], index: 3, kind: input, shape index: {}]   ;;  %s1471_s4 = inlined_call_operand.vmem [shape: f32[1,32], index: 4, kind: input, shape index: {}]   ;;  %s1472_s5 = inlined_call_operand.vmem [shape: bf16[32,16], index: 5, kind: input, shape index: {}]   ;;  %s1473_s6 = inlined_call_operand.vmem [shape: f32[1,16], index: 6, kind: input, shape index: {}]   ;;  %s1474_s7 = inlined_call_operand.vmem [shape: bf16[16,96], index: 7, kind: input, shape index: {}]   ;;  %s1475_s8 = inlined_call_operand.vmem [shape: f32[1,32], index: 8, kind: input, shape index: {}]   ;;  %s1476_s9 = inlined_call_operand.vmem [shape: bf16[16,96], index: 9, kind: input, shape index: {}]   ;;  %s1477_s10 = inlined_call_operand.vmem [shape: f32[1,32], index: 10, kind: input, shape index: {}]   ;;  %s1478_s11 = inlined_call_operand.vmem [shape: bf16[16,16], index: 11, kind: input, shape index: {}]   ;;  %s1479_s12 = inlined_call_operand.vmem [shape: f32[1,16], index: 12, kind: input, shape index: {}]   ;;  %s1480_s13 = inlined_call_operand.vmem [shape: bf16[16,16], index: 13, kind: input, shape index: {}]   ;;  %s1481_s14 = inlined_call_operand.vmem [shape: f32[1,16], index: 14, kind: input, shape index: {}]   ;;  %s1482_s15 = inlined_call_operand.vmem [shape: bf16[16,32], index: 15, kind: input, shape index: {}]   ;;  %s1483_s16 = inlined_call_operand.vmem [shape: f32[1,32], index: 16, kind: input, shape index: {}]   ;;  %s1484_s17 = inlined_call_operand.vmem [shape: f32[2,8,32], index: 17, kind: output, shape index: {0}]   ;;  %s1485_s18 = inlined_call_operand.vmem [shape: f32[2,8,32], index: 18, kind: output, shape index: {1}]  }
   0x1   :  { %1486 = sst [smem:[#allocation2_spill]] %s1467_s0 }
   0x2   :  { %1487 = sst [smem:[#allocation3_spill]] %s1468_s1 }
   0x3   :  { %1488 = sst [smem:[#allocation4_spill]] %s1469_s2 }
   0x4 LB: > { %s1129_s28 = sadd.s32 4294967295, %s1235_s27   ;;  %p1133_p0 = scmp.ge.s32.totalorder %s1235_s27, 1  ;;  %s1235_s27 = sphi %s1337_s27, %s29_s27  }
   0x5   : > { %p531_p1 = scmp.lt.s32.totalorder %s1235_s27, 3 }
   0x7   : > { %p532_p2 = pnand %p1133_p0, %p531_p1 }
   0x8   : > { %p594_p3 = scmp.lt.s32.totalorder (!%p532_p2), %s1129_s28, 1  ;;  %s1489_s19 = sld [smem:[#allocation2_spill]] (!%p532_p2) }
   0x9   : > { %535 = sbr.rel (%p532_p2) target bundleno = 2131 (0x853), region = 88  ;;  %s1490_s25 = sld [smem:[#allocation3_spill]] (!%p532_p2) }
   0xa   : > { %s1239_s23 = smov (!%p532_p2), 96   ;;  %s1240_s24 = smov (!%p532_p2), 64  }
   0xb   : > { %s1241_s30 = smov (!%p532_p2), 112  }
   0xe   : > { %s1493_s28 = smov (!%p594_p3, %s1129_s28), 1  ;;  %vm618_vm0 = vcmask 261120   ;;  %v1237_v2 = vmov 32.0   ;;  %v1180_v14 = vld [vmem:[%s1472_s5 + $0x8] sm:$0xff]  ;;  %v1179_v15 = vld [vmem:[%s1472_s5] sm:$0xff]  ;;  %v1238_v18 = vmov 0   ;;  %v695_v45 = vlaneseq }
   0xf   : > { %s1348_s29 = sshll.u32 %s1493_s28, 3  ;;  %1209 = vrcp.f32 %v1237_v2  ;;  %688 = vmatpush.bf16.msra.mxu0 %v1180_v14  ;;  %1199 = vset.pattern.permute.xlu1 %v1238_v18  ;;  %v1201_v28 = vld [vmem:[%s1470_s3] ss:$0 sm:$0xff]  ;;  %vm712_vm7 = vcmask 130048  }
  0x10   : > { %s597_s1 = scalar_lea.vmem %s1489_s19, %s1348_s29  ;;  %s601_s26 = scalar_lea.vmem %s1490_s25, %s1348_s29  ;;  %1200 = vset.pattern.permute.xlu0 %v1238_v18  ;;  %v1202_v31 = vld [vmem:[%s1471_s4] ss:$0 sm:$0xff]  ;;  %v696_v46 = vshrl.u32 %v695_v45, 7 }
  0x11   : > { %v617_v0 = vld [vmem:[%s597_s1] sm:$0xff]  ;;  %s608_s25 = scalar_lea.vmem %s1484_s17, %s1348_s29 }
  0x12   : > { %v619_v1 = vsel %vm618_vm0, %v617_v0, 0.0  ;;  %v614_v16 = vld [vmem:[%s601_s26] sm:$0xff]  ;;  %v730_v47 = vadd.s32 4294967295, %v696_v46  ;;  %v747_v48 = vadd.s32 1, %v696_v46  ;;  %s1491_s26 = sld [smem:[#allocation4_spill]] }
  0x13   : > { %620 = vadd.xlane.f32.xlu0 %v619_v1  ;;  %689 = vmatpush.bf16.msra.mxu0 %v1179_v15  ;;  %vm615_vm2 = vcmp.gt.f32.partialorder %v614_v16, 0.0  ;;  %v1181_v35 = vld [vmem:[%s1474_s7] sm:$0xff] }
  0x14   : > { %v697_v20 = vsel %vm615_vm2, 1, %v1238_v18  ;;  %723 = vmatpush.bf16.msra.mxu1 %v1181_v35  ;;  %v1203_v36 = vld [vmem:[%s1473_s6] ss:$0 sm:$0xff]  ;;  %vm731_vm8 = vcmp.ge.s32.totalorder %v730_v47, 0  ;;  %vm749_vm9 = vcmp.lt.s32.totalorder %v747_v48, 8 }
  0x15   : > { %v1210_v3 = vpop.eup %1209  ;;  %699 = vperm.xlu1 %1199, %v697_v20   ;;  %v1204_v55 = vld [vmem:[%s1475_s8] ss:$0 sm:$0xff] }
  0x16   : > { %v623_v4 = vmul.f32 32.0, %v1210_v3  ;;  %vm627_vm1 = vweird.f32 %v1210_v3  ;;  %v1206_v47 = vld [vmem:[%s1479_s12] ss:$0 sm:$0xff] }
  0x18   : > { %v624_v5 = vsub.f32 1.0, %v623_v4 }
  0x1a   : > { %v625_v6 = vmul.f32 %v1210_v3, %v624_v5 }
  0x1c   : > { %v626_v7 = vadd.f32 %v1210_v3, %v625_v6 }
  0x1e   : > { %v628_v8 = vsel %vm627_vm1, %v1210_v3, %v626_v7 }
  0x86   : > { %v621_v9 = vpop.xlane.xlu0 %620 }
  0x87   : > { %v629_v10 = vmul.f32 %v628_v8, %v621_v9  ;;  %v1386_v37 = vpop.permute.xlu1 %699 }
  0x88   : > { %vm701_vm6 = vcmp.eq.s32.totalorder %v1386_v37, 1 }
  0x89   : > { %v630_v11 = vsub.f32 %v617_v0, %v629_v10 }
  0x8b   : > { %v631_v12 = vmul.f32 %v630_v11, %v630_v11 }
  0x8d   : > { %v632_v13 = vsel %vm618_vm0, %v631_v12, 0.0 }
  0x8e   : > { %633 = vadd.xlane.f32.xlu0 %v632_v13 }
 0x101   : > { %v634_v17 = vpop.xlane.xlu0 %633 }
 0x102   : > { %v635_v19 = vmul.f32 %v634_v17, %v628_v8  ;;  %v1182_v8 = vld [vmem:[%s1476_s9] sm:$0xff] }
 0x103   : > { %804 = vmatpush.bf16.msra.mxu2 %v1182_v8 }
 0x104   : > { %v636_v21 = vadd.f32 1e-05, %v635_v19 }
 0x106   : > { %1211 = vrsqrt.f32 %v636_v21  ;;  %vm643_vm4 = vweird.f32 %v636_v21 }
 0x10c   : > { %v1212_v22 = vpop.eup %1211 }
 0x10d   : > { %v638_v23 = vmul.f32 %v1212_v22, %v636_v21  ;;  %vm644_vm3 = vweird.f32 %v1212_v22 }
 0x10e   : > { %vm645_vm5 = vmor %vm643_vm4, %vm644_vm3  ;;  %vm922_vm3 = vcmask 1043456  }
 0x10f   : > { %v639_v24 = vmul.f32 %v1212_v22, %v638_v23 }
 0x111   : > { %v640_v25 = vmul.f32 0.5, %v639_v24 }
 0x113   : > { %v641_v26 = vsub.f32 1.5, %v640_v25 }
 0x115   : > { %v642_v27 = vmul.f32 %v1212_v22, %v641_v26 }
 0x117   : > { %v646_v29 = vsel %vm645_vm5, %v1212_v22, %v642_v27  ;;  %v1205_v22 = vld [vmem:[%s1477_s10] ss:$0 sm:$0xff] }
 0x118   : > { %v647_v30 = vmul.f32 %v646_v29, %v630_v11 }
 0x11a   : > { %v652_v32 = vmul.f32 %v1201_v28, %v647_v30 }
 0x11c   : > { %v1375_v33 = vadd.f32 %v1202_v31, %v652_v32 }
 0x11e   : > { %v658_v34 = vpack.c.bf16 %v1375_v33, %v1375_v33 }
 0x120   : > { %1146 = vmatmul.msk.bf16.vlgmr.msra.gmra.mxu0 %vm618_vm0, %v658_v34 }
 0x19d   : > { %v691_v38 = vpop.f32.mrf.mxu0 }
 0x19e   : > { %v692_v39 = vadd.f32 %v1203_v36, %v691_v38 }
 0x1a0   : > { %v702_v40 = vsel %vm701_vm6, 0.0, %v692_v39 }
 0x1a1   : > { %v703_v41 = vpack.c.bf16 %v702_v40, %v702_v40 }
 0x1a3   : > { %1151 = vmatmul.msk.bf16.vlgmr.msra.gmra.mxu1 %vm712_vm7, %v703_v41  ;;  %v1183_v41 = vld [vmem:[%s1478_s11] sm:$0xff] }
 0x1a4   : > { %876 = vmatpush.bf16.msra.mxu3 %v1183_v41 }
 0x1a5   : > { %v693_v42 = vpop.f32.mrf.mxu0 }
 0x220   : > { %v725_v43 = vpop.f32.mrf.mxu1 }
 0x221   : > { %739 = vrot.lane.b32.xlu2 %v725_v43, %s1239_s23  ;;  %743 = vrot.lane.b32.xlu1 %v725_v43, %s1240_s24  ;;  %v729_v49 = vrot.slane %v725_v43, 7 }
 0x223   : > { %v736_v52 = vsel %vm731_vm8, %v729_v49, 0.0 }
 0x228   : > { %v727_v44 = vpop.f32.mrf.mxu1 }
 0x27b   : > { %v740_v50 = vpop.permute.xlu2 %739 }
 0x27c   : > { %v742_v54 = vadd.f32 %v740_v50, %v736_v52 }
 0x293   : > { %v744_v51 = vpop.permute.xlu1 %743 }
 0x294   : > { %v746_v53 = vrot.slane %v744_v51, 1 }
 0x296   : > { %v753_v56 = vsel %vm749_vm9, %v746_v53, 0.0 }
 0x297   : > { %v754_v57 = vadd.f32 %v753_v56, %v742_v54 }
 0x299   : > { %v759_v58 = vadd.f32 %v1204_v55, %v754_v57 }
 0x29b   : > { %v1152_v59 = vmul.f32 -1.442695, %v759_v58 }
 0x29d   : > { %1213 = vpow2.f32 %v1152_v59 }
 0x2a3   : > { %v1214_v60 = vpop.eup %1213 }
 0x2a4   : > { %v763_v61 = vadd.f32 1.0, %v1214_v60 }
 0x2a6   : > { %1215 = vrcp.f32 %v763_v61  ;;  %v775_v1 = vand.u32 2147483648, %v763_v61  ;;  %v773_v3 = vand.u32 2147483647, %v763_v61  ;;  %vm769_vm11 = vweird.f32 %v763_v61 }
 0x2a8   : > { %v776_v5 = vor.u32 1.1754944e-38, %v775_v1  ;;  %vm774_vm13 = vcmp.eq.f32.partialorder %v773_v3, 8.507059e+37 }
 0x2ac   : > { %v1216_v62 = vpop.eup %1215 }
 0x2ad   : > { %v765_v63 = vmul.f32 %v1216_v62, %v763_v61  ;;  %vm770_vm10 = vweird.f32 %v1216_v62 }
 0x2ae   : > { %vm771_vm12 = vmor %vm769_vm11, %vm770_vm10 }
 0x2af   : > { %v766_v0 = vsub.f32 1.0, %v765_v63 }
 0x2b1   : > { %v767_v2 = vmul.f32 %v1216_v62, %v766_v0 }
 0x2b3   : > { %v768_v4 = vadd.f32 %v1216_v62, %v767_v2 }
 0x2b5   : > { %v772_v6 = vsel %vm771_vm12, %v1216_v62, %v768_v4 }
 0x2b6   : > { %v777_v7 = vsel %vm774_vm13, %v776_v5, %v772_v6 }
 0x2b7   : > { %780 = vrot.lane.b32.xlu2 %v777_v7, %s1241_s30 }
 0x311   : > { %v781_v9 = vpop.permute.xlu2 %780 }
 0x312   : > { %v783_v10 = vmul.f32 %v781_v9, %v759_v58 }
 0x314   : > { %v784_v11 = vsel %vm701_vm6, 0.0, %v783_v10  ;;  %v1185_v10 = vld [vmem:[%s1482_s15] sm:$0xff] }
 0x315   : > { %v785_v12 = vpack.c.bf16 %v784_v11, %v784_v11  ;;  %1013 = vmatpush.bf16.msrb.mxu0 %v1185_v10 }
 0x317   : > { %1157 = vmatmul.msk.bf16.vlgmr.msra.gmra.mxu2 %vm712_vm7, %v785_v12 }
 0x39a   : > { %v806_v13 = vpop.f32.mrf.mxu2 }
 0x39b   : > { %814 = vrot.lane.b32.xlu1 %v806_v13, %s1239_s23  ;;  %818 = vrot.lane.b32.xlu0 %v806_v13, %s1240_s24  ;;  %v810_v15 = vrot.slane %v806_v13, 7 }
 0x39d   : > { %v811_v17 = vsel %vm731_vm8, %v810_v15, 0.0  ;;  %vm906_vm8 = vcmask 64512  }
 0x3a2   : > { %v808_v14 = vpop.f32.mrf.mxu2 }
 0x40d   : > { %v815_v16 = vpop.permute.xlu1 %814  ;;  %v819_v19 = vpop.permute.xlu0 %818 }
 0x40e   : > { %v817_v20 = vadd.f32 %v815_v16, %v811_v17  ;;  %v821_v21 = vrot.slane %v819_v19, 1 }
 0x410   : > { %v822_v23 = vsel %vm749_vm9, %v821_v21, 0.0 }
 0x411   : > { %v823_v24 = vadd.f32 %v822_v23, %v817_v20 }
 0x413   : > { %v828_v25 = vadd.f32 %v1205_v22, %v823_v24 }
 0x415   : > { %v1158_v26 = vmul.f32 -1.442695, %v828_v25 }
 0x417   : > { %1217 = vpow2.f32 %v1158_v26 }
 0x41d   : > { %v1218_v27 = vpop.eup %1217 }
 0x41e   : > { %v832_v28 = vadd.f32 1.0, %v1218_v27 }
 0x420   : > { %1219 = vrcp.f32 %v832_v28  ;;  %v844_v32 = vand.u32 2147483648, %v832_v28  ;;  %v842_v35 = vand.u32 2147483647, %v832_v28  ;;  %vm838_vm15 = vweird.f32 %v832_v28 }
 0x422   : > { %v845_v38 = vor.u32 1.1754944e-38, %v844_v32  ;;  %vm843_vm2 = vcmp.eq.f32.partialorder %v842_v35, 8.507059e+37 }
 0x426   : > { %v1220_v29 = vpop.eup %1219 }
 0x427   : > { %v834_v30 = vmul.f32 %v1220_v29, %v832_v28  ;;  %vm839_vm14 = vweird.f32 %v1220_v29 }
 0x428   : > { %vm840_vm1 = vmor %vm838_vm15, %vm839_vm14 }
 0x429   : > { %v835_v31 = vsub.f32 1.0, %v834_v30 }
 0x42b   : > { %v836_v34 = vmul.f32 %v1220_v29, %v835_v31 }
 0x42d   : > { %v837_v36 = vadd.f32 %v1220_v29, %v836_v34  ;;  %v1208_v34 = vld [vmem:[%s1483_s16] ss:$0 sm:$0xff] }
 0x42f   : > { %v841_v39 = vsel %vm840_vm1, %v1220_v29, %v837_v36 }
 0x430   : > { %v846_v40 = vsel %vm843_vm2, %v845_v38, %v841_v39 }
 0x431   : > { %849 = vrot.lane.b32.xlu2 %v846_v40, %s1241_s30  ;;  %s604_s30 = scalar_lea.vmem %s1491_s26, %s1493_s28  ;;  %s612_s28 = scalar_lea.vmem %s1485_s18, %s1348_s29 }
 0x432   : > { %v616_v54 = vld [vmem:[%s604_s30] sm:$0x1] }
 0x433   : > { %vm901_vm4 = vcmp.gt.f32.partialorder %v616_v54, 0.0 }
 0x434   : > { %v902_v55 = vsel %vm901_vm4, 1, %v1238_v18  ;;  %v1184_v18 = vld [vmem:[%s1480_s13] sm:$0xff] }
 0x435   : > { %v903_v56 = vperm.slane %v902_v55, 0  ;;  %962 = vmatpush.bf16.msrb.mxu3 %v1184_v18 }
 0x437   : > { %vm904_vm5 = vcmp.eq.s32.totalorder %v903_v56, 1 }
 0x48b   : > { %v850_v42 = vpop.permute.xlu2 %849 }
 0x48c   : > { %v1417_v43 = vmul.f32 %v850_v42, %v828_v25 }
 0x48e   : > { %v853_v44 = vpack.c.bf16 %v1417_v43, %v1417_v43 }
 0x490   : > { %1163 = vmatmul.msk.bf16.vlgmr.msra.gmra.mxu3 %vm712_vm7, %v853_v44  ;;  %v867_v45 = vsel %vm712_vm7, %v853_v44, 0  ;;  %v923_v46 = vsel %vm922_vm3, %v853_v44, 0 }
 0x491   : > { %895 = vmatpush.bf16.xpose.msrb.mxu1 %v867_v45  ;;  %932 = vmatpush.bf16.msrb.mxu2 %v923_v46 }
 0x513   : > { %v878_v48 = vpop.f32.mrf.mxu3 }
 0x514   : > { %v879_v49 = vadd.f32 %v1206_v47, %v878_v48 }
 0x516   : > { %v882_v50 = vadd.f32 %v879_v49, %v784_v11  ;;  %v1207_v11 = vld [vmem:[%s1481_s14] ss:$0 sm:$0xff] }
 0x518   : > { %v883_v51 = vmul.f32 0.70710677, %v882_v50 }
 0x51a   : > { %v884_v52 = vpack.c.bf16 %v883_v51, %v883_v51 }
 0x51b   : > { %v880_v53 = vpop.f32.mrf.mxu3 }
 0x51c   : > { %1164 = vmatmul.msk.bf16.vlgmr.msrb.gmra.mxu1 %vm712_vm7, %v884_v52 }
 0x599   : > { %v897_v57 = vpop.f32.mrf.mxu1 }
 0x59a   : > { %v905_v58 = vsel %vm904_vm5, -1e+09, %v897_v57 }
 0x59b   : > { %v907_v59 = vsel %vm906_vm8, %v905_v58, -inf }
 0x59c   : > { %908 = vmax.xlane.f32.xlu1 %v907_v59 }
 0x5a1   : > { %v899_v60 = vpop.f32.mrf.mxu1 }
 0x60f   : > { %v909_v61 = vpop.xlane.xlu1 %908 }
 0x610   : > { %v910_v62 = vsub.f32 %v905_v58, %v909_v61 }
 0x612   : > { %v911_v63 = vmul.f32 1.442695, %v910_v62 }
 0x614   : > { %1221 = vpow2.f32 %v911_v63 }
 0x61a   : > { %v1222_v0 = vpop.eup %1221 }
 0x61b   : > { %v913_v1 = vsel %vm906_vm8, %v1222_v0, 0.0 }
 0x61c   : > { %914 = vadd.xlane.f32.xlu2 %v913_v1 }
 0x68f   : > { %v915_v2 = vpop.xlane.xlu2 %914 }
 0x690   : > { %1223 = vrcp.f32 %v915_v2 }
 0x696   : > { %v1224_v3 = vpop.eup %1223 }
 0x697   : > { %v917_v4 = vmul.f32 %v1224_v3, %v1222_v0 }
 0x699   : > { %v918_v5 = vpack.c.bf16 %v917_v4, %v917_v4 }
 0x69b   : > { %1165 = vmatmul.msk.bf16.vlgmr.msrb.gmra.mxu2 %vm906_vm8, %v918_v5 }
 0x71e   : > { %v934_v6 = vpop.f32.mrf.mxu2 }
 0x71f   : > { %v938_v7 = vmul.f32 2.828427, %v934_v6 }
 0x721   : > { %v939_v8 = vpack.c.bf16 %v938_v7, %v938_v7 }
 0x723   : > { %1170 = vmatmul.msk.bf16.vlgmr.msrb.gmra.mxu3 %vm712_vm7, %v939_v8 }
 0x726   : > { %v936_v9 = vpop.f32.mrf.mxu2 }
 0x7a6   : > { %v964_v12 = vpop.f32.mrf.mxu3 }
 0x7a7   : > { %v965_v13 = vadd.f32 %v1207_v11, %v964_v12 }
 0x7a9   : > { %v968_v14 = vadd.f32 %v965_v13, %v1417_v43 }
 0x7ab   : > { %v1171_v15 = vmul.f32 -0.70710677, %v968_v14 }
 0x7ad   : > { %v971_v16 = vmul.f32 1.442695, %v1171_v15 }
 0x7ae   : > { %v966_v17 = vpop.f32.mrf.mxu3 }
 0x7af   : > { %1225 = vpow2.f32 %v971_v16 }
 0x7b5   : > { %v1226_v19 = vpop.eup %1225 }
 0x7b6   : > { %v973_v20 = vadd.f32 1.0, %v1226_v19 }
 0x7b8   : > { %1227 = vrcp.f32 %v973_v20  ;;  %v985_v24 = vand.u32 2147483648, %v973_v20  ;;  %v983_v26 = vand.u32 2147483647, %v973_v20  ;;  %vm979_vm10 = vweird.f32 %v973_v20 }
 0x7ba   : > { %v986_v28 = vor.u32 1.1754944e-38, %v985_v24  ;;  %vm984_vm12 = vcmp.eq.f32.partialorder %v983_v26, 8.507059e+37 }
 0x7be   : > { %v1228_v21 = vpop.eup %1227 }
 0x7bf   : > { %v975_v22 = vmul.f32 %v1228_v21, %v973_v20  ;;  %vm980_vm9 = vweird.f32 %v1228_v21 }
 0x7c0   : > { %vm981_vm11 = vmor %vm979_vm10, %vm980_vm9 }
 0x7c1   : > { %v976_v23 = vsub.f32 1.0, %v975_v22 }
 0x7c3   : > { %v977_v25 = vmul.f32 %v1228_v21, %v976_v23 }
 0x7c5   : > { %v978_v27 = vadd.f32 %v1228_v21, %v977_v25 }
 0x7c7   : > { %v982_v29 = vsel %vm981_vm11, %v1228_v21, %v978_v27 }
 0x7c8   : > { %v987_v30 = vsel %vm984_vm12, %v986_v28, %v982_v29 }
 0x7c9   : > { %v989_v31 = vmul.f32 %v987_v30, %v1417_v43 }
 0x7cb   : > { %v990_v32 = vpack.c.bf16 %v989_v31, %v989_v31 }
 0x7cd   : > { %1176 = vmatmul.msk.bf16.vlgmr.msrb.gmra.mxu0 %vm712_vm7, %v990_v32 }
 0x84a   : > { %v1015_v35 = vpop.f32.mrf.mxu0 }
 0x84b   : > { %v1016_v36 = vadd.f32 %v1208_v34, %v1015_v35 }
 0x84d   : > { %v1019_v38 = vsel %vm701_vm6, 0.0, %v1016_v36 }
 0x84e   : > { %1020 = vst.msk [vmem:[%s608_s25] sm:$0xff] %vm618_vm0, %v1019_v38  ;;  %v1021_v39 = vadd.f32 %v1019_v38, %v1375_v33 }
 0x850   : > { %v1022_v40 = vmul.f32 0.70710677, %v1021_v39 }
 0x852   : > { %1023 = vst.msk [vmem:[%s612_s28] sm:$0xff] %vm618_vm0, %v1022_v40  ;;  %v1017_v41 = vpop.f32.mrf.mxu0 }
 0x853 PF: > { %s29_s27 = sadd.s32 1, %s1235_s27  }
 0x854   : > { %p26_p4 = scmp.ge.s32.totalorder %s29_s27, 4  }
 0x856   :  { %28 = sbr.rel (!%p26_p4) target bundleno = 4 (0x4), region = 136 }

// kernel: gpt_conut_encoder_forward.3
= control target key start
LH: loop header
LB: loop body
LE: loop exit
PB: predicated region body
PF: predicated region fallthrough
CT: control target
= control target key end

     0   :  { %s1457_s27 = smov 0   ;;  %s1648_s0 = inlined_call_operand.vmem [shape: f32[2,8,32], index: 0, kind: input, shape index: {}]   ;;  %s1649_s1 = inlined_call_operand.vmem [shape: f32[2,8,1], index: 1, kind: input, shape index: {}]   ;;  %s1650_s2 = inlined_call_operand.vmem [shape: f32[2,1,8], index: 2, kind: input, shape index: {}]   ;;  %s1651_s3 = inlined_call_operand.vmem [shape: f32[1,32], index: 3, kind: input, shape index: {}]   ;;  %s1652_s4 = inlined_call_operand.vmem [shape: f32[1,32], index: 4, kind: input, shape index: {}]   ;;  %s1653_s5 = inlined_call_operand.vmem [shape: bf16[32,32], index: 5, kind: input, shape index: {}]   ;;  %s1654_s6 = inlined_call_operand.vmem [shape: f32[1,32], index: 6, kind: input, shape index: {}]   ;;  %s1655_s7 = inlined_call_operand.vmem [shape: bf16[32,192], index: 7, kind: input, shape index: {}]   ;;  %s1656_s8 = inlined_call_operand.vmem [shape: f32[1,64], index: 8, kind: input, shape index: {}]   ;;  %s1657_s9 = inlined_call_operand.vmem [shape: bf16[32,192], index: 9, kind: input, shape index: {}]   ;;  %s1658_s10 = inlined_call_operand.vmem [shape: f32[1,64], index: 10, kind: input, shape index: {}]   ;;  %s1659_s11 = inlined_call_operand.vmem [shape: bf16[32,32], index: 11, kind: input, shape index: {}]   ;;  %s1660_s12 = inlined_call_operand.vmem [shape: f32[1,32], index: 12, kind: input, shape index: {}]   ;;  %s1661_s13 = inlined_call_operand.vmem [shape: bf16[32,32], index: 13, kind: input, shape index: {}]   ;;  %s1662_s14 = inlined_call_operand.vmem [shape: f32[1,32], index: 14, kind: input, shape index: {}]   ;;  %s1663_s15 = inlined_call_operand.vmem [shape: bf16[32,32], index: 15, kind: input, shape index: {}]   ;;  %s1664_s16 = inlined_call_operand.vmem [shape: f32[1,32], index: 16, kind: input, shape index: {}]   ;;  %s1665_s17 = inlined_call_operand.vmem [shape: f32[2,8,32], index: 17, kind: output, shape index: {0}]   ;;  %s1666_s18 = inlined_call_operand.vmem [shape: f32[2,8,32], index: 18, kind: output, shape index: {1}]  }
   0x1   :  { %1667 = sst [smem:[#allocation2_spill]] %s1648_s0 }
   0x2   :  { %1668 = sst [smem:[#allocation3_spill]] %s1649_s1 }
   0x3   :  { %1669 = sst [smem:[#allocation4_spill]] %s1650_s2 }
   0x4 LB: > { %s1204_s28 = sadd.s32 4294967295, %s1356_s27   ;;  %p1208_p0 = scmp.ge.s32.totalorder %s1356_s27, 1  ;;  %s1356_s27 = sphi %s1457_s27, %s29_s27  }
   0x5   : > { %p531_p1 = scmp.lt.s32.totalorder %s1356_s27, 3 }
   0x7   : > { %p532_p2 = pnand %p1208_p0, %p531_p1 }
   0x8   : > { %p594_p3 = scmp.lt.s32.totalorder (!%p532_p2), %s1204_s28, 1  ;;  %s1670_s19 = sld [smem:[#allocation2_spill]] (!%p532_p2) }
   0x9   : > { %535 = sbr.rel (%p532_p2) target bundleno = 2123 (0x84b), region = 88  ;;  %s1671_s25 = sld [smem:[#allocation3_spill]] (!%p532_p2) }
   0xa   : > { %s1361_s24 = smov (!%p532_p2), 96   ;;  %s1672_s21 = sld [smem:[#allocation4_spill]] (!%p532_p2) }
   0xe   : > { %s1674_s28 = smov (!%p594_p3, %s1204_s28), 1  ;;  %vm618_vm0 = vcmask 261120   ;;  %v1358_v2 = vmov 32.0   ;;  %v1293_v14 = vld [vmem:[%s1653_s5 + $0x8] sm:$0xff]  ;;  %v1292_v15 = vld [vmem:[%s1653_s5] sm:$0xff]  ;;  %v1359_v20 = vmov 0   ;;  %v695_v58 = vlaneseq }
   0xf   : > { %s1468_s29 = sshll.u32 %s1674_s28, 3  ;;  %1330 = vrcp.f32 %v1358_v2  ;;  %688 = vmatpush.bf16.msra.mxu0 %v1293_v14  ;;  %v1232_v17 = vld [vmem:[%s1655_s7 + $0x10] sm:$0xf]  ;;  %v1297_v18 = vld [vmem:[%s1655_s7 + $0x14] sm:$0xf0]  ;;  %1320 = vset.pattern.permute.xlu1 %v1359_v20 }
  0x10   : > { %s597_s1 = scalar_lea.vmem %s1670_s19, %s1468_s29  ;;  %s601_s26 = scalar_lea.vmem %s1671_s25, %s1468_s29  ;;  %v1233_v21 = vor.u32 %v1297_v18, %v1232_v17  ;;  %v1296_v22 = vld [vmem:[%s1655_s7 + $0x14] sm:$0xf]  ;;  %v1234_v23 = vld [vmem:[%s1655_s7 + $0x18] sm:$0xf0]  ;;  %1321 = vset.pattern.permute.xlu0 %v1359_v20  ;;  %v1322_v34 = vld [vmem:[%s1651_s3] ss:$0 sm:$0xff] }
  0x11   : > { %v617_v0 = vld [vmem:[%s597_s1] sm:$0xff]  ;;  %v1237_v26 = vor.u32 %v1296_v22, %v1234_v23  ;;  %v1295_v42 = vld [vmem:[%s1655_s7 + $0x4] sm:$0xf0]  ;;  %v1226_v45 = vld [vmem:[%s1655_s7 + $0x8] sm:$0xf0]  ;;  %s1360_s25 = smov 64   ;;  %s604_s22 = scalar_lea.vmem %s1672_s21, %s1674_s28 }
  0x12   : > { %v619_v1 = vsel %vm618_vm0, %v617_v0, 0.0  ;;  %v614_v16 = vld [vmem:[%s601_s26] sm:$0xff]  ;;  %737 = vmatpush.bf16.msra.mxu1 %v1233_v21  ;;  %v696_v59 = vshrl.u32 %v695_v58, 7  ;;  %s608_s2 = scalar_lea.vmem %s1665_s17, %s1468_s29  ;;  %s612_s30 = scalar_lea.vmem %s1666_s18, %s1468_s29 }
  0x13   : > { %620 = vadd.xlane.f32.xlu0 %v619_v1  ;;  %689 = vmatpush.bf16.msra.mxu0 %v1292_v15  ;;  %vm615_vm2 = vcmp.gt.f32.partialorder %v614_v16, 0.0  ;;  %v1323_v37 = vld [vmem:[%s1652_s4] ss:$0 sm:$0xff]  ;;  %v1294_v43 = vld [vmem:[%s1655_s7 + $0x4] sm:$0xf] }
  0x14   : > { %v697_v25 = vsel %vm615_vm2, 1, %v1359_v20  ;;  %750 = vmatpush.bf16.msra.mxu2 %v1237_v26  ;;  %v1224_v41 = vld [vmem:[%s1655_s7] sm:$0xf]  ;;  %v1229_v46 = vor.u32 %v1294_v43, %v1226_v45  ;;  %v1535_v60 = vadd.s32 4294967295, %v696_v59  ;;  %v1537_v61 = vadd.s32 1, %v696_v59 }
  0x15   : > { %v1331_v3 = vpop.eup %1330  ;;  %699 = vperm.xlu1 %1320, %v697_v25   ;;  %v1225_v44 = vor.u32 %v1295_v42, %v1224_v41  ;;  %v1324_v47 = vld [vmem:[%s1654_s6] ss:$0 sm:$0xff]  ;;  %vm981_vm2 = vcmask 1043456  }
  0x16   : > { %v623_v4 = vmul.f32 32.0, %v1331_v3  ;;  %vm627_vm1 = vweird.f32 %v1331_v3  ;;  %vm759_vm7 = vcmp.ge.s32.totalorder %v1535_v60, 0  ;;  %vm774_vm8 = vcmp.lt.s32.totalorder %v1537_v61, 8  ;;  %v1325_v2 = vld [vmem:[%s1656_s8] ss:$0 sm:$0xff] }
  0x17   : > { %738 = vmatpush.bf16.msra.mxu1 %v1225_v44 }
  0x18   : > { %v624_v5 = vsub.f32 1.0, %v623_v4  ;;  %751 = vmatpush.bf16.msra.mxu2 %v1229_v46  ;;  %v1326_v46 = vld [vmem:[%s1658_s10] ss:$0 sm:$0xff] }
  0x1a   : > { %v625_v6 = vmul.f32 %v1331_v3, %v624_v5 }
  0x1c   : > { %v626_v7 = vadd.f32 %v1331_v3, %v625_v6  ;;  %v1251_v6 = vld [vmem:[%s1657_s9 + $0x10] sm:$0xf] }
  0x1e   : > { %v628_v8 = vsel %vm627_vm1, %v1331_v3, %v626_v7  ;;  %v1301_v7 = vld [vmem:[%s1657_s9 + $0x14] sm:$0xf0] }
  0x86   : > { %v621_v9 = vpop.xlane.xlu0 %620 }
  0x87   : > { %v629_v10 = vmul.f32 %v628_v8, %v621_v9  ;;  %v1527_v48 = vpop.permute.xlu1 %699  ;;  %v1252_v9 = vor.u32 %v1301_v7, %v1251_v6 }
  0x88   : > { %vm701_vm6 = vcmp.eq.s32.totalorder %v1527_v48, 1 }
  0x89   : > { %v630_v11 = vsub.f32 %v617_v0, %v629_v10  ;;  %v1253_v10 = vld [vmem:[%s1657_s9 + $0x18] sm:$0xf0]  ;;  %844 = vmatpush.bf16.msra.mxu3 %v1252_v9 }
  0x8b   : > { %v631_v12 = vmul.f32 %v630_v11, %v630_v11 }
  0x8d   : > { %v632_v13 = vsel %vm618_vm0, %v631_v12, 0.0 }
  0x8e   : > { %633 = vadd.xlane.f32.xlu0 %v632_v13 }
 0x101   : > { %v634_v19 = vpop.xlane.xlu0 %633 }
 0x102   : > { %v635_v24 = vmul.f32 %v634_v19, %v628_v8  ;;  %v1300_v8 = vld [vmem:[%s1657_s9 + $0x14] sm:$0xf] }
 0x103   : > { %v1256_v12 = vor.u32 %v1300_v8, %v1253_v10  ;;  %v1327_v8 = vld [vmem:[%s1660_s12] ss:$0 sm:$0xff] }
 0x104   : > { %v636_v27 = vadd.f32 1e-05, %v635_v24 }
 0x105   : > { %857 = vmatpush.bf16.msrb.mxu0 %v1256_v12 }
 0x106   : > { %1332 = vrsqrt.f32 %v636_v27  ;;  %vm643_vm4 = vweird.f32 %v636_v27 }
 0x10c   : > { %v1333_v28 = vpop.eup %1332 }
 0x10d   : > { %v638_v29 = vmul.f32 %v1333_v28, %v636_v27  ;;  %vm644_vm3 = vweird.f32 %v1333_v28  ;;  %v1243_v27 = vld [vmem:[%s1657_s9] sm:$0xf] }
 0x10e   : > { %vm645_vm5 = vmor %vm643_vm4, %vm644_vm3 }
 0x10f   : > { %v639_v30 = vmul.f32 %v1333_v28, %v638_v29  ;;  %v1298_v29 = vld [vmem:[%s1657_s9 + $0x4] sm:$0xf] }
 0x111   : > { %v640_v31 = vmul.f32 0.5, %v639_v30 }
 0x113   : > { %v641_v32 = vsub.f32 1.5, %v640_v31  ;;  %v1245_v31 = vld [vmem:[%s1657_s9 + $0x8] sm:$0xf0] }
 0x115   : > { %v642_v33 = vmul.f32 %v1333_v28, %v641_v32  ;;  %v1248_v32 = vor.u32 %v1298_v29, %v1245_v31 }
 0x117   : > { %v646_v35 = vsel %vm645_vm5, %v1333_v28, %v642_v33  ;;  %v1299_v28 = vld [vmem:[%s1657_s9 + $0x4] sm:$0xf0]  ;;  %858 = vmatpush.bf16.msrb.mxu0 %v1248_v32  ;;  %vm965_vm5 = vcmask 64512  }
 0x118   : > { %v647_v36 = vmul.f32 %v646_v35, %v630_v11  ;;  %v1244_v30 = vor.u32 %v1299_v28, %v1243_v27  ;;  %v1304_v28 = vld [vmem:[%s1661_s13] sm:$0xff] }
 0x11a   : > { %v652_v38 = vmul.f32 %v1322_v34, %v647_v36  ;;  %845 = vmatpush.bf16.msra.mxu3 %v1244_v30 }
 0x11c   : > { %v1507_v39 = vadd.f32 %v1323_v37, %v652_v38 }
 0x11e   : > { %v658_v40 = vpack.c.bf16 %v1507_v39, %v1507_v39 }
 0x120   : > { %1221 = vmatmul.msk.bf16.vlgmr.msra.gmra.mxu0 %vm618_vm0, %v658_v40 }
 0x19d   : > { %v691_v49 = vpop.f32.mrf.mxu0 }
 0x19e   : > { %v692_v50 = vadd.f32 %v1324_v47, %v691_v49 }
 0x1a0   : > { %v702_v51 = vsel %vm701_vm6, 0.0, %v692_v50 }
 0x1a1   : > { %v703_v52 = vpack.c.bf16 %v702_v51, %v702_v51  ;;  %v1303_v51 = vld [vmem:[%s1659_s11 + $0x8] sm:$0xff] }
 0x1a2   : > { %934 = vmatpush.bf16.msrb.mxu1 %v1303_v51 }
 0x1a3   : > { %1238 = vmatmul.msk.bf16.vlgmr.msra.gmra.mxu1 %vm618_vm0, %v703_v52  ;;  %1239 = vmatmul.msk.bf16.vlgmr.msra.gmra.mxu2 %vm618_vm0, %v703_v52 }
 0x1a5   : > { %v693_v53 = vpop.f32.mrf.mxu0 }
 0x1a6   : > { %v1302_v53 = vld [vmem:[%s1659_s11] sm:$0xff] }
 0x1a7   : > { %935 = vmatpush.bf16.msrb.mxu1 %v1302_v53 }
 0x220   : > { %v740_v54 = vpop.f32.mrf.mxu1 }
 0x221   : > { %767 = vrot.lane.b32.xlu1 %v740_v54, %s1360_s25  ;;  %v757_v62 = vrot.slane %v740_v54, 7 }
 0x223   : > { %v764_v1 = vsel %vm759_vm7, %v757_v62, 0.0 }
 0x226   : > { %v753_v55 = vpop.f32.mrf.mxu2 }
 0x227   : > { %v771_v63 = vrot.slane %v753_v55, 1 }
 0x228   : > { %v742_v56 = vpop.f32.mrf.mxu1 }
 0x229   : > { %v778_v4 = vsel %vm774_vm8, %v771_v63, 0.0 }
 0x22e   : > { %v755_v57 = vpop.f32.mrf.mxu2 }
 0x293   : > { %v768_v0 = vpop.permute.xlu1 %767 }
 0x294   : > { %v770_v3 = vadd.f32 %v768_v0, %v764_v1 }
 0x296   : > { %v779_v5 = vadd.f32 %v778_v4, %v770_v3 }
 0x298   : > { %v784_v11 = vadd.f32 %v1325_v2, %v779_v5 }
 0x29a   : > { %v1240_v13 = vmul.f32 -1.442695, %v784_v11 }
 0x29c   : > { %1334 = vpow2.f32 %v1240_v13 }
 0x2a2   : > { %v1335_v14 = vpop.eup %1334 }
 0x2a3   : > { %v788_v15 = vadd.f32 1.0, %v1335_v14 }
 0x2a5   : > { %1336 = vrcp.f32 %v788_v15  ;;  %v800_v19 = vand.u32 2147483648, %v788_v15  ;;  %v798_v22 = vand.u32 2147483647, %v788_v15  ;;  %vm794_vm10 = vweird.f32 %v788_v15 }
 0x2a7   : > { %v801_v24 = vor.u32 1.1754944e-38, %v800_v19  ;;  %vm799_vm12 = vcmp.eq.f32.partialorder %v798_v22, 8.507059e+37 }
 0x2ab   : > { %v1337_v16 = vpop.eup %1336 }
 0x2ac   : > { %v790_v17 = vmul.f32 %v1337_v16, %v788_v15  ;;  %vm795_vm9 = vweird.f32 %v1337_v16  ;;  %v616_v15 = vld [vmem:[%s604_s22] sm:$0x1] }
 0x2ad   : > { %vm796_vm11 = vmor %vm794_vm10, %vm795_vm9  ;;  %vm960_vm3 = vcmp.gt.f32.partialorder %v616_v15, 0.0 }
 0x2ae   : > { %v791_v18 = vsub.f32 1.0, %v790_v17 }
 0x2b0   : > { %v792_v21 = vmul.f32 %v1337_v16, %v791_v18 }
 0x2b2   : > { %v793_v23 = vadd.f32 %v1337_v16, %v792_v21 }
 0x2b4   : > { %v797_v25 = vsel %vm796_vm11, %v1337_v16, %v793_v23  ;;  %v961_v16 = vsel %vm960_vm3, 1, %v1359_v20  ;;  %v1305_v20 = vld [vmem:[%s1661_s13 + $0x8] sm:$0xff] }
 0x2b5   : > { %v802_v26 = vsel %vm799_vm12, %v801_v24, %v797_v25  ;;  %v962_v17 = vperm.slane %v961_v16, 0  ;;  %1028 = vmatpush.bf16.msra.mxu0 %v1305_v20 }
 0x2b6   : > { %805 = vrot.lane.b32.xlu2 %v802_v26, %s1361_s24 }
 0x2b7   : > { %vm963_vm4 = vcmp.eq.s32.totalorder %v962_v17, 1 }
 0x2b9   : > { %1029 = vmatpush.bf16.msra.mxu0 %v1304_v28 }
 0x310   : > { %v806_v33 = vpop.permute.xlu2 %805 }
 0x311   : > { %v808_v34 = vmul.f32 %v806_v33, %v784_v11 }
 0x313   : > { %v809_v35 = vsel %vm701_vm6, 0.0, %v808_v34 }
 0x314   : > { %v810_v36 = vpack.c.bf16 %v809_v35, %v809_v35 }
 0x316   : > { %1257 = vmatmul.msk.bf16.vlgmr.msra.gmra.mxu3 %vm618_vm0, %v810_v36  ;;  %1258 = vmatmul.msk.bf16.vlgmr.msrb.gmra.mxu0 %vm618_vm0, %v810_v36 }
 0x393   : > { %v860_v37 = vpop.f32.mrf.mxu0 }
 0x394   : > { %v872_v43 = vrot.slane %v860_v37, 1  ;;  %v1328_v37 = vld [vmem:[%s1662_s14] ss:$0 sm:$0xff] }
 0x396   : > { %v873_v49 = vsel %vm774_vm8, %v872_v43, 0.0 }
 0x399   : > { %v847_v38 = vpop.f32.mrf.mxu3 }
 0x39a   : > { %868 = vrot.lane.b32.xlu2 %v847_v38, %s1360_s25  ;;  %v864_v42 = vrot.slane %v847_v38, 7  ;;  %v1307_v38 = vld [vmem:[%s1663_s15 + $0x8] sm:$0xff] }
 0x39b   : > { %v862_v40 = vpop.f32.mrf.mxu0  ;;  %1087 = vmatpush.bf16.msra.mxu1 %v1307_v38 }
 0x39c   : > { %v865_v45 = vsel %vm759_vm7, %v864_v42, 0.0  ;;  %v1306_v40 = vld [vmem:[%s1663_s15] sm:$0xff] }
 0x39f   : > { %1088 = vmatpush.bf16.msra.mxu1 %v1306_v40 }
 0x3a1   : > { %v849_v41 = vpop.f32.mrf.mxu3 }
 0x3f4   : > { %v869_v44 = vpop.permute.xlu2 %868 }
 0x3f5   : > { %v871_v47 = vadd.f32 %v869_v44, %v865_v45 }
 0x3f7   : > { %v874_v50 = vadd.f32 %v873_v49, %v871_v47 }
 0x3f9   : > { %v879_v52 = vadd.f32 %v1326_v46, %v874_v50 }
 0x3fb   : > { %v1259_v54 = vmul.f32 -1.442695, %v879_v52 }
 0x3fd   : > { %1338 = vpow2.f32 %v1259_v54 }
 0x403   : > { %v1339_v55 = vpop.eup %1338 }
 0x404   : > { %v883_v56 = vadd.f32 1.0, %v1339_v55 }
 0x406   : > { %1340 = vrcp.f32 %v883_v56  ;;  %v895_v60 = vand.u32 2147483648, %v883_v56  ;;  %v893_v62 = vand.u32 2147483647, %v883_v56  ;;  %vm889_vm14 = vweird.f32 %v883_v56 }
 0x408   : > { %v896_v0 = vor.u32 1.1754944e-38, %v895_v60  ;;  %vm894_vm1 = vcmp.eq.f32.partialorder %v893_v62, 8.507059e+37  ;;  %v1329_v62 = vld [vmem:[%s1664_s16] ss:$0 sm:$0xff] }
 0x40c   : > { %v1341_v57 = vpop.eup %1340 }
 0x40d   : > { %v885_v58 = vmul.f32 %v1341_v57, %v883_v56  ;;  %vm890_vm13 = vweird.f32 %v1341_v57 }
 0x40e   : > { %vm891_vm15 = vmor %vm889_vm14, %vm890_vm13 }
 0x40f   : > { %v886_v59 = vsub.f32 1.0, %v885_v58 }
 0x411   : > { %v887_v61 = vmul.f32 %v1341_v57, %v886_v59 }
 0x413   : > { %v888_v63 = vadd.f32 %v1341_v57, %v887_v61 }
 0x415   : > { %v892_v1 = vsel %vm891_vm15, %v1341_v57, %v888_v63 }
 0x416   : > { %v897_v2 = vsel %vm894_vm1, %v896_v0, %v892_v1 }
 0x417   : > { %900 = vrot.lane.b32.xlu0 %v897_v2, %s1361_s24 }
 0x489   : > { %v901_v3 = vpop.permute.xlu0 %900 }
 0x48a   : > { %v1592_v4 = vmul.f32 %v901_v3, %v879_v52 }
 0x48c   : > { %v904_v5 = vpack.c.bf16 %v1592_v4, %v1592_v4 }
 0x48e   : > { %1268 = vmatmul.msk.bf16.vlgmr.msrb.gmra.mxu1 %vm618_vm0, %v904_v5  ;;  %v926_v6 = vsel %vm618_vm0, %v904_v5, 0  ;;  %v982_v7 = vsel %vm981_vm2, %v904_v5, 0 }
 0x48f   : > { %954 = vmatpush.bf16.xpose.msrb.mxu2 %v926_v6  ;;  %991 = vmatpush.bf16.msrb.mxu3 %v982_v7 }
 0x50b   : > { %v937_v9 = vpop.f32.mrf.mxu1 }
 0x50c   : > { %v938_v10 = vadd.f32 %v1327_v8, %v937_v9 }
 0x50e   : > { %v941_v11 = vadd.f32 %v938_v10, %v809_v35 }
 0x510   : > { %v942_v12 = vmul.f32 0.70710677, %v941_v11 }
 0x512   : > { %v943_v13 = vpack.c.bf16 %v942_v12, %v942_v12 }
 0x513   : > { %v939_v14 = vpop.f32.mrf.mxu1 }
 0x514   : > { %1269 = vmatmul.msk.bf16.vlgmr.msrb.gmra.mxu2 %vm618_vm0, %v943_v13 }
 0x597   : > { %v956_v18 = vpop.f32.mrf.mxu2 }
 0x598   : > { %v964_v19 = vsel %vm963_vm4, -1e+09, %v956_v18 }
 0x599   : > { %v966_v21 = vsel %vm965_vm5, %v964_v19, -inf }
 0x59a   : > { %967 = vmax.xlane.f32.xlu1 %v966_v21 }
 0x59f   : > { %v958_v22 = vpop.f32.mrf.mxu2 }
 0x60d   : > { %v968_v23 = vpop.xlane.xlu1 %967 }
 0x60e   : > { %v969_v24 = vsub.f32 %v964_v19, %v968_v23 }
 0x610   : > { %v970_v25 = vmul.f32 1.442695, %v969_v24 }
 0x612   : > { %1342 = vpow2.f32 %v970_v25 }
 0x618   : > { %v1343_v26 = vpop.eup %1342 }
 0x619   : > { %v972_v27 = vsel %vm965_vm5, %v1343_v26, 0.0 }
 0x61a   : > { %973 = vadd.xlane.f32.xlu2 %v972_v27 }
 0x68d   : > { %v974_v29 = vpop.xlane.xlu2 %973 }
 0x68e   : > { %1344 = vrcp.f32 %v974_v29 }
 0x694   : > { %v1345_v30 = vpop.eup %1344 }
 0x695   : > { %v976_v31 = vmul.f32 %v1345_v30, %v1343_v26 }
 0x697   : > { %v977_v32 = vpack.c.bf16 %v976_v31, %v976_v31 }
 0x699   : > { %1270 = vmatmul.msk.bf16.vlgmr.msrb.gmra.mxu3 %vm965_vm5, %v977_v32 }
 0x71c   : > { %v993_v33 = vpop.f32.mrf.mxu3 }
 0x71d   : > { %v997_v34 = vmul.f32 2.828427, %v993_v33 }
 0x71f   : > { %v998_v35 = vpack.c.bf16 %v997_v34, %v997_v34 }
 0x721   : > { %1279 = vmatmul.msk.bf16.vlgmr.msra.gmra.mxu0 %vm618_vm0, %v998_v35 }
 0x724   : > { %v995_v36 = vpop.f32.mrf.mxu3 }
 0x79e   : > { %v1031_v41 = vpop.f32.mrf.mxu0 }
 0x79f   : > { %v1032_v42 = vadd.f32 %v1328_v37, %v1031_v41 }
 0x7a1   : > { %v1035_v43 = vadd.f32 %v1032_v42, %v1592_v4 }
 0x7a3   : > { %v1280_v44 = vmul.f32 -0.70710677, %v1035_v43 }
 0x7a5   : > { %v1038_v45 = vmul.f32 1.442695, %v1280_v44 }
 0x7a6   : > { %v1033_v46 = vpop.f32.mrf.mxu0 }
 0x7a7   : > { %1346 = vpow2.f32 %v1038_v45 }
 0x7ad   : > { %v1347_v47 = vpop.eup %1346 }
 0x7ae   : > { %v1040_v49 = vadd.f32 1.0, %v1347_v47 }
 0x7b0   : > { %1348 = vrcp.f32 %v1040_v49  ;;  %v1052_v53 = vand.u32 2147483648, %v1040_v49  ;;  %v1050_v55 = vand.u32 2147483647, %v1040_v49  ;;  %vm1046_vm8 = vweird.f32 %v1040_v49 }
 0x7b2   : > { %v1053_v57 = vor.u32 1.1754944e-38, %v1052_v53  ;;  %vm1051_vm10 = vcmp.eq.f32.partialorder %v1050_v55, 8.507059e+37 }
 0x7b6   : > { %v1349_v50 = vpop.eup %1348 }
 0x7b7   : > { %v1042_v51 = vmul.f32 %v1349_v50, %v1040_v49  ;;  %vm1047_vm7 = vweird.f32 %v1349_v50 }
 0x7b8   : > { %vm1048_vm9 = vmor %vm1046_vm8, %vm1047_vm7 }
 0x7b9   : > { %v1043_v52 = vsub.f32 1.0, %v1042_v51 }
 0x7bb   : > { %v1044_v54 = vmul.f32 %v1349_v50, %v1043_v52 }
 0x7bd   : > { %v1045_v56 = vadd.f32 %v1349_v50, %v1044_v54 }
 0x7bf   : > { %v1049_v58 = vsel %vm1048_vm9, %v1349_v50, %v1045_v56 }
 0x7c0   : > { %v1054_v59 = vsel %vm1051_vm10, %v1053_v57, %v1049_v58 }
 0x7c1   : > { %v1056_v60 = vmul.f32 %v1054_v59, %v1592_v4 }
 0x7c3   : > { %v1057_v61 = vpack.c.bf16 %v1056_v60, %v1056_v60 }
 0x7c5   : > { %1289 = vmatmul.msk.bf16.vlgmr.msra.gmra.mxu1 %vm618_vm0, %v1057_v61 }
 0x842   : > { %v1090_v63 = vpop.f32.mrf.mxu1 }
 0x843   : > { %v1091_v0 = vadd.f32 %v1329_v62, %v1090_v63 }
 0x845   : > { %v1094_v1 = vsel %vm701_vm6, 0.0, %v1091_v0 }
 0x846   : > { %1095 = vst.msk [vmem:[%s608_s2] sm:$0xff] %vm618_vm0, %v1094_v1  ;;  %v1096_v2 = vadd.f32 %v1094_v1, %v1507_v39 }
 0x848   : > { %v1097_v3 = vmul.f32 0.70710677, %v1096_v2 }
 0x84a   : > { %1098 = vst.msk [vmem:[%s612_s30] sm:$0xff] %vm618_vm0, %v1097_v3  ;;  %v1092_v4 = vpop.f32.mrf.mxu1 }
 0x84b PF: > { %s29_s27 = sadd.s32 1, %s1356_s27  }
 0x84c   : > { %p26_p4 = scmp.ge.s32.totalorder %s29_s27, 4  }
 0x84e   :  { %28 = sbr.rel (!%p26_p4) target bundleno = 4 (0x4), region = 136 }

</bundles_post_ra>
